<compile_context>
chip_gen: v6e
topology: v6e:2x2x1
jax: 0.10.0
libtpu: 0.0.40
codegen_flags: <defaults>
</compile_context>

<pallas_src>
import math

import numpy as np
import jax
import jax.numpy as jnp
from jax.experimental import pallas as pl
from jax.experimental.pallas import tpu as pltpu


_TT_MAX = 16  # max GRU time steps per grid iteration (amortizes ~0.35us/step pipeline overhead)


def _gru_kernel(gi_ref, h0_ref, whh_ref, bhn_ref, lens_ref, out_ref, h_scratch):
    """One grid step == TT GRU time steps over the whole (small) batch.

    gi_ref  : (TT*B, 3H) bf16  precomputed x @ W_ih^T + (b_ih + [b_hr, b_hz, 0]), time-major
    h0_ref  : (B, H)     f32   initial hidden            (grid-invariant)
    whh_ref : (H, 3H)    bf16  W_hh^T                    (grid-invariant)
    bhn_ref : (1, H)     f32   b_hn (applied inside r*(...), per torch semantics)
    lens_ref: (B, H)     i32   sequence lengths, lane-broadcast (grid-invariant)
    out_ref : (TT*B, H)  f32   outputs for this time block
    h_scratch: (B, H)    f32   persistent recurrent state
    """
    s = pl.program_id(0)

    @pl.when(s == 0)
    def _():
        h_scratch[...] = h0_ref[...].astype(jnp.float32)

    B, H = h_scratch.shape
    TT = out_ref.shape[0] // B
    # Group per-step outputs into >=8-sublane chunks for unmasked stores.
    if B < 8 and 8 % B == 0:
        gsteps = 8 // B
    else:
        gsteps = 1

    # Grid-invariant operands: load once per block, outside the unrolled time loop.
    whh = whh_ref[...]                     # (H, 3H) bf16 -- held across the TT matmuls
    bhn = bhn_ref[...]                     # (1, H)  f32
    lens = lens_ref[...]                   # (B, H)  int32
    t0 = s * TT
    h = h_scratch[...]                     # f32 carry, lives in vregs across the unroll

    outs = []
    for tt in range(TT):                   # static unroll (TT is small, compile-time)
        row_gi = tt * B
        gi = gi_ref[pl.ds(row_gi, B), :]   # (B, 3H) bf16 -- input projection already done
        # bf16 x bf16 -> f32 MXU matmul (serial critical path of the recurrence).
        gh = jnp.dot(h.astype(jnp.bfloat16), whh,
                     preferred_element_type=jnp.float32)            # (B, 3H) f32
        # gate order matches torch.nn.GRU: [r, z, n]; b_ir+b_hr / b_iz+b_hz already in gi.
        r = jax.nn.sigmoid(gi[:, 0 * H:1 * H] + gh[:, 0 * H:1 * H])
        z = jax.nn.sigmoid(gi[:, 1 * H:2 * H] + gh[:, 1 * H:2 * H])
        n = jnp.tanh(gi[:, 2 * H:3 * H] + r * (gh[:, 2 * H:3 * H] + bhn))
        h_new = n + z * (h - n)            # == (1 - z) * n + z * h, one fewer VPU op

        # pack_padded_sequence semantics: steps >= lens[b] freeze h and emit zeros.
        valid = (t0 + tt) < lens           # (B, H) bool
        outs.append(jnp.where(valid, h_new, 0.0))
        h = jnp.where(valid, h_new, h)

        if (tt + 1) % gsteps == 0:
            row_o = (tt + 1 - gsteps) * B
            blk = outs[0] if gsteps == 1 else jnp.concatenate(outs, axis=0)
            out_ref[pl.ds(row_o, gsteps * B), :] = blk.astype(out_ref.dtype)
            outs = []

    if outs:                               # defensive flush (only if TT % gsteps != 0)
        row_o = (TT - len(outs)) * B
        blk = outs[0] if len(outs) == 1 else jnp.concatenate(outs, axis=0)
        out_ref[pl.ds(row_o, len(outs) * B), :] = blk.astype(out_ref.dtype)

    h_scratch[...] = h


def gru_model_forward(obs, last_acts, pre_hidden, lens, params):
    """Pallas equivalent of GRU_Model.forward.

    obs:        (B, T, obs_dim)      float32
    last_acts:  (B, T, action_dim)   float32
    pre_hidden: (B, H) or (1, B, H)  float32
    lens:       (B,) int             (host / numpy values, like torch lens)
    returns:    (B, max(lens), H)    float32
    """
    if pre_hidden.ndim == 3:
        pre_hidden = pre_hidden[0]
    lens = np.asarray(lens, dtype=np.int32)
    B = obs.shape[0]
    H = params["w_hh"].shape[1]
    t_max = int(lens.max())                            # cap the time grid at max(lens)

    # Time-block size: as large as _TT_MAX, aligned so TT*B is a multiple of 16
    # (bf16 sublane packing) whenever the block is not the full array extent.
    step = 16 // math.gcd(B, 16)
    TT = min(_TT_MAX, t_max)
    TT = -(-TT // step) * step                         # round up to alignment
    n_blocks = -(-t_max // TT)                         # cdiv
    T_pad = n_blocks * TT

    w_ih_t = jnp.transpose(params["w_ih"]).astype(jnp.float32)     # (Din, 3H)
    w_hh_t = jnp.transpose(params["w_hh"]).astype(jnp.bfloat16)    # (H, 3H) bf16 MXU operand
    b_ih = params["b_ih"].astype(jnp.float32)                      # (3H,)
    b_hh = params["b_hh"].astype(jnp.float32)                      # (3H,)
    # Fold b_hr, b_hz into the input-projection bias; b_hn stays in-kernel because
    # torch applies it inside r * (W_hn h + b_hn).
    gi_bias = b_ih.at[:2 * H].add(b_hh[:2 * H])
    bhn = b_hh[2 * H:].reshape(1, H)

    # Hoisted input projection: one well-shaped f32 matmul over all valid time steps,
    # produced directly in time-major layout, then cast to bf16 (halves Gi streaming).
    sta_acs = jnp.concatenate([obs[:, :t_max], last_acts[:, :t_max]], axis=-1)
    gi = jnp.einsum("btd,dg->tbg", sta_acs.astype(jnp.float32), w_ih_t) + gi_bias
    gi = jnp.pad(gi, ((0, T_pad - t_max), (0, 0), (0, 0)))          # (T_pad, B, 3H)
    gi_flat = gi.reshape(T_pad * B, 3 * H).astype(jnp.bfloat16)

    lens_bcast = jnp.broadcast_to(jnp.asarray(lens, jnp.int32)[:, None], (B, H))

    out_flat = pl.pallas_call(
        _gru_kernel,
        out_shape=jax.ShapeDtypeStruct((T_pad * B, H), jnp.float32),
        grid=(n_blocks,),
        in_specs=[
            pl.BlockSpec((TT * B, 3 * H), lambda s: (s, 0)),        # Gi time block (bf16)
            pl.BlockSpec((B, H), lambda s: (0, 0)),                 # h0        (invariant)
            pl.BlockSpec((H, 3 * H), lambda s: (0, 0)),             # W_hh^T    (invariant, bf16)
            pl.BlockSpec((1, H), lambda s: (0, 0)),                 # b_hn      (invariant)
            pl.BlockSpec((B, H), lambda s: (0, 0)),                 # lens      (invariant)
        ],
        out_specs=pl.BlockSpec((TT * B, H), lambda s: (s, 0)),
        scratch_shapes=[pltpu.VMEM((B, H), jnp.float32)],
        compiler_params=pltpu.CompilerParams(
            dimension_semantics=("arbitrary",)),                    # recurrence -> sequential
    )(gi_flat, pre_hidden.astype(jnp.float32), w_hh_t, bhn, lens_bcast)

    # pad_packed_sequence(batch_first=True): slice to max(lens) first, then transpose.
    out = out_flat.reshape(T_pad, B, H)[:t_max]
    return jnp.transpose(out, (1, 0, 2))


def _gru_reference(obs, last_acts, pre_hidden, lens, params):
    """Pure-JAX f32 reference (same math as torch.nn.GRU + pack/pad semantics)."""
    x = jnp.concatenate([obs, last_acts], axis=-1).astype(jnp.float32)  # (B, T, D)
    B, T, _ = x.shape
    H = params["w_hh"].shape[1]
    w_ih, w_hh = params["w_ih"], params["w_hh"]
    b_ih, b_hh = params["b_ih"], params["b_hh"]
    lens_arr = jnp.asarray(np.asarray(lens, dtype=np.int32))

    def step(h, inp):
        x_t, t = inp
        gi = x_t @ w_ih.T + b_ih
        gh = h @ w_hh.T + b_hh
        r = jax.nn.sigmoid(gi[:, :H] + gh[:, :H])
        z = jax.nn.sigmoid(gi[:, H:2 * H] + gh[:, H:2 * H])
        n = jnp.tanh(gi[:, 2 * H:] + r * gh[:, 2 * H:])
        h_new = (1.0 - z) * n + z * h
        valid = (t < lens_arr)[:, None]
        h_out = jnp.where(valid, h_new, h)
        y = jnp.where(valid, h_new, 0.0)
        return h_out, y

    h0 = pre_hidden[0] if pre_hidden.ndim == 3 else pre_hidden
    _, ys = jax.lax.scan(step, h0.astype(jnp.float32),
                         (jnp.transpose(x, (1, 0, 2)), jnp.arange(T)))
    t_max = int(np.asarray(lens).max())
    return jnp.transpose(ys, (1, 0, 2))[:, :t_max, :]


def init_params(key, input_dim, hidden):
    """Deterministic init matching torch.nn.GRU parameter shapes."""
    k = 1.0 / np.sqrt(hidden)
    k1, k2, k3, k4 = jax.random.split(key, 4)
    return {
        "w_ih": jax.random.uniform(k1, (3 * hidden, input_dim), jnp.float32, -k, k),
        "w_hh": jax.random.uniform(k2, (3 * hidden, hidden), jnp.float32, -k, k),
        "b_ih": jax.random.uniform(k3, (3 * hidden,), jnp.float32, -k, k),
        "b_hh": jax.random.uniform(k4, (3 * hidden,), jnp.float32, -k, k),
    }


if __name__ == "__main__":
    obs_dim, action_dim, hidden = 6, 2, 128
    B, T = 2, 8
    lens = np.array([8, 5], dtype=np.int32)

    key = jax.random.PRNGKey(0)
    kp, ko, ka, kh = jax.random.split(key, 4)
    params = init_params(kp, obs_dim + action_dim, hidden)

    obs = jax.random.normal(ko, (B, T, obs_dim), jnp.float32)
    last_acts = jax.random.normal(ka, (B, T, action_dim), jnp.float32)
    pre_hidden = jax.random.normal(kh, (1, B, hidden), jnp.float32)  # like get_hidden's (1, B, H)

    out = gru_model_forward(obs, last_acts, pre_hidden, lens, params)
    out = jax.block_until_ready(out)

    ref = jax.block_until_ready(_gru_reference(obs, last_acts, pre_hidden, lens, params))
    assert out.shape == (B, int(lens.max()), hidden), out.shape
    # bf16 matmul operands (f32 accumulation / gates / carry): bf16-level tolerance.
    np.testing.assert_allclose(np.asarray(out), np.asarray(ref), rtol=3e-2, atol=3e-2)

    print("KERNEL_OK")
</pallas_src>

<mosaic_0001>
module attributes {stable_mosaic.version = 11 : i64} {
  func.func @_gru_kernel(%arg0: i32, %arg1: memref<16x384xbf16, #tpu.memory_space<vmem>>, %arg2: memref<2x128xf32, #tpu.memory_space<vmem>>, %arg3: memref<128x384xbf16, #tpu.memory_space<vmem>>, %arg4: memref<1x128xf32, #tpu.memory_space<vmem>>, %arg5: memref<2x128xi32, #tpu.memory_space<vmem>>, %arg6: memref<16x128xf32, #tpu.memory_space<vmem>>, %arg7: memref<2x128xf32, #tpu.memory_space<vmem>>) attributes {dimension_semantics = [#tpu.dimension_semantics<arbitrary>], iteration_bounds = array<i64: 1>, scalar_prefetch = 0 : i64, scratch_operands = 1 : i64, tpu.core_type = #tpu.core_type<tc>, window_params = [{transform_indices = @transform_0, window_bounds = array<i64: 16, 384>}, {pipeline_mode = #tpu.pipeline_mode<synchronous>, transform_indices = @transform_1, window_bounds = array<i64: 2, 128>}, {pipeline_mode = #tpu.pipeline_mode<synchronous>, transform_indices = @transform_2, window_bounds = array<i64: 128, 384>}, {pipeline_mode = #tpu.pipeline_mode<synchronous>, transform_indices = @transform_3, window_bounds = array<i64: 1, 128>}, {pipeline_mode = #tpu.pipeline_mode<synchronous>, transform_indices = @transform_4, window_bounds = array<i64: 2, 128>}, {transform_indices = @transform_5, window_bounds = array<i64: 16, 128>}]} {
    %c0_i32 = arith.constant 0 : i32
    %0 = arith.cmpi eq, %arg0, %c0_i32 : i32
    %1 = arith.extui %0 : i1 to i32
    %c0_i32_0 = arith.constant 0 : i32
    %2 = arith.cmpi ne, %1, %c0_i32_0 : i32
    scf.if %2 {
      %c0_55 = arith.constant 0 : index
      %c0_56 = arith.constant 0 : index
      %317 = vector.load %arg2[%c0_55, %c0_56] : memref<2x128xf32, #tpu.memory_space<vmem>>, vector<2x128xf32>
      %c0_57 = arith.constant 0 : index
      %c0_58 = arith.constant 0 : index
      %318 = vector.load %arg7[%c0_57, %c0_58] : memref<2x128xf32, #tpu.memory_space<vmem>>, vector<2x128xf32>
      tpu.vector_store %arg7[%c0_57, %c0_58], %317 {strides = array<i32>} : memref<2x128xf32, #tpu.memory_space<vmem>>, vector<2x128xf32>,
    } else {
    }
    %c0 = arith.constant 0 : index
    %c0_1 = arith.constant 0 : index
    %3 = vector.load %arg3[%c0, %c0_1] : memref<128x384xbf16, #tpu.memory_space<vmem>>, vector<128x384xbf16>
    %c0_2 = arith.constant 0 : index
    %c0_3 = arith.constant 0 : index
    %4 = vector.load %arg4[%c0_2, %c0_3] : memref<1x128xf32, #tpu.memory_space<vmem>>, vector<1x128xf32>
    %c0_4 = arith.constant 0 : index
    %c0_5 = arith.constant 0 : index
    %5 = vector.load %arg5[%c0_4, %c0_5] : memref<2x128xi32, #tpu.memory_space<vmem>>, vector<2x128xi32>
    %c8_i32 = arith.constant 8 : i32
    %6 = arith.muli %arg0, %c8_i32 : i32
    %c0_6 = arith.constant 0 : index
    %c0_7 = arith.constant 0 : index
    %7 = vector.load %arg7[%c0_6, %c0_7] : memref<2x128xf32, #tpu.memory_space<vmem>>, vector<2x128xf32>
    %c0_8 = arith.constant 0 : index
    %c0_9 = arith.constant 0 : index
    %8 = vector.load %arg1[%c0_8, %c0_9] : memref<16x384xbf16, #tpu.memory_space<vmem>>, vector<2x384xbf16>
    %9 = arith.truncf %7 : vector<2x128xf32> to vector<2x128xbf16>
    %cst = arith.constant dense<0.000000e+00> : vector<2x384xf32>
    %10 = tpu.matmul %9, %3, %cst {dimension_numbers = #tpu.dot_dimension_numbers<[1], [0], [0], [1], [0, 0, 1, 1], [], []>} : vector<2x128xbf16>, vector<128x384xbf16>, vector<2x384xf32> -> vector<2x384xf32>
    %11 = vector.extract_strided_slice %8 {offsets = [0, 0], sizes = [2, 128], strides = [1, 1]} : vector<2x384xbf16> to vector<2x128xbf16>
    %12 = vector.extract_strided_slice %10 {offsets = [0, 0], sizes = [2, 128], strides = [1, 1]} : vector<2x384xf32> to vector<2x128xf32>
    %13 = arith.extf %11 : vector<2x128xbf16> to vector<2x128xf32>
    %14 = arith.addf %13, %12 : vector<2x128xf32>
    %15 = arith.negf %14 : vector<2x128xf32>
    %16 = math.exp %15 : vector<2x128xf32>
    %cst_10 = arith.constant 1.000000e+00 : f32
    %17 = vector.broadcast %cst_10 : f32 to vector<2x128xf32>
    %18 = arith.addf %17, %16 : vector<2x128xf32>
    %19 = arith.divf %17, %18 : vector<2x128xf32>
    %20 = vector.extract_strided_slice %8 {offsets = [0, 128], sizes = [2, 128], strides = [1, 1]} : vector<2x384xbf16> to vector<2x128xbf16>
    %21 = vector.extract_strided_slice %10 {offsets = [0, 128], sizes = [2, 128], strides = [1, 1]} : vector<2x384xf32> to vector<2x128xf32>
    %22 = arith.extf %20 : vector<2x128xbf16> to vector<2x128xf32>
    %23 = arith.addf %22, %21 : vector<2x128xf32>
    %24 = arith.negf %23 : vector<2x128xf32>
    %25 = math.exp %24 : vector<2x128xf32>
    %cst_11 = arith.constant 1.000000e+00 : f32
    %26 = vector.broadcast %cst_11 : f32 to vector<2x128xf32>
    %27 = arith.addf %26, %25 : vector<2x128xf32>
    %28 = arith.divf %26, %27 : vector<2x128xf32>
    %29 = vector.extract_strided_slice %8 {offsets = [0, 256], sizes = [2, 128], strides = [1, 1]} : vector<2x384xbf16> to vector<2x128xbf16>
    %30 = vector.extract_strided_slice %10 {offsets = [0, 256], sizes = [2, 128], strides = [1, 1]} : vector<2x384xf32> to vector<2x128xf32>
    %31 = vector.broadcast %4 : vector<1x128xf32> to vector<2x128xf32>
    %32 = arith.addf %30, %31 : vector<2x128xf32>
    %33 = arith.mulf %19, %32 : vector<2x128xf32>
    %34 = arith.extf %29 : vector<2x128xbf16> to vector<2x128xf32>
    %35 = arith.addf %34, %33 : vector<2x128xf32>
    %36 = math.tanh %35 : vector<2x128xf32>
    %37 = arith.subf %7, %36 : vector<2x128xf32>
    %38 = arith.mulf %28, %37 : vector<2x128xf32>
    %39 = arith.addf %36, %38 : vector<2x128xf32>
    %c0_i32_12 = arith.constant 0 : i32
    %40 = arith.addi %6, %c0_i32_12 : i32
    %41 = vector.broadcast %40 : i32 to vector<2x128xi32>
    %42 = arith.cmpi slt, %41, %5 : vector<2x128xi32>
    %cst_13 = arith.constant 0.000000e+00 : f32
    %43 = vector.broadcast %cst_13 : f32 to vector<2x128xf32>
    %44 = arith.select %42, %39, %43 : vector<2x128xi1>, vector<2x128xf32>
    %45 = arith.select %42, %39, %7 : vector<2x128xi1>, vector<2x128xf32>
    %c2 = arith.constant 2 : index
    %c0_14 = arith.constant 0 : index
    %46 = vector.load %arg1[%c2, %c0_14] : memref<16x384xbf16, #tpu.memory_space<vmem>>, vector<2x384xbf16>
    %47 = arith.truncf %45 : vector<2x128xf32> to vector<2x128xbf16>
    %cst_15 = arith.constant dense<0.000000e+00> : vector<2x384xf32>
    %48 = tpu.matmul %47, %3, %cst_15 {dimension_numbers = #tpu.dot_dimension_numbers<[1], [0], [0], [1], [0, 0, 1, 1], [], []>} : vector<2x128xbf16>, vector<128x384xbf16>, vector<2x384xf32> -> vector<2x384xf32>
    %49 = vector.extract_strided_slice %46 {offsets = [0, 0], sizes = [2, 128], strides = [1, 1]} : vector<2x384xbf16> to vector<2x128xbf16>
    %50 = vector.extract_strided_slice %48 {offsets = [0, 0], sizes = [2, 128], strides = [1, 1]} : vector<2x384xf32> to vector<2x128xf32>
    %51 = arith.extf %49 : vector<2x128xbf16> to vector<2x128xf32>
    %52 = arith.addf %51, %50 : vector<2x128xf32>
    %53 = arith.negf %52 : vector<2x128xf32>
    %54 = math.exp %53 : vector<2x128xf32>
    %cst_16 = arith.constant 1.000000e+00 : f32
    %55 = vector.broadcast %cst_16 : f32 to vector<2x128xf32>
    %56 = arith.addf %55, %54 : vector<2x128xf32>
    %57 = arith.divf %55, %56 : vector<2x128xf32>
    %58 = vector.extract_strided_slice %46 {offsets = [0, 128], sizes = [2, 128], strides = [1, 1]} : vector<2x384xbf16> to vector<2x128xbf16>
    %59 = vector.extract_strided_slice %48 {offsets = [0, 128], sizes = [2, 128], strides = [1, 1]} : vector<2x384xf32> to vector<2x128xf32>
    %60 = arith.extf %58 : vector<2x128xbf16> to vector<2x128xf32>
    %61 = arith.addf %60, %59 : vector<2x128xf32>
    %62 = arith.negf %61 : vector<2x128xf32>
    %63 = math.exp %62 : vector<2x128xf32>
    %cst_17 = arith.constant 1.000000e+00 : f32
    %64 = vector.broadcast %cst_17 : f32 to vector<2x128xf32>
    %65 = arith.addf %64, %63 : vector<2x128xf32>
    %66 = arith.divf %64, %65 : vector<2x128xf32>
    %67 = vector.extract_strided_slice %46 {offsets = [0, 256], sizes = [2, 128], strides = [1, 1]} : vector<2x384xbf16> to vector<2x128xbf16>
    %68 = vector.extract_strided_slice %48 {offsets = [0, 256], sizes = [2, 128], strides = [1, 1]} : vector<2x384xf32> to vector<2x128xf32>
    %69 = vector.broadcast %4 : vector<1x128xf32> to vector<2x128xf32>
    %70 = arith.addf %68, %69 : vector<2x128xf32>
    %71 = arith.mulf %57, %70 : vector<2x128xf32>
    %72 = arith.extf %67 : vector<2x128xbf16> to vector<2x128xf32>
    %73 = arith.addf %72, %71 : vector<2x128xf32>
    %74 = math.tanh %73 : vector<2x128xf32>
    %75 = arith.subf %45, %74 : vector<2x128xf32>
    %76 = arith.mulf %66, %75 : vector<2x128xf32>
    %77 = arith.addf %74, %76 : vector<2x128xf32>
    %c1_i32 = arith.constant 1 : i32
    %78 = arith.addi %6, %c1_i32 : i32
    %79 = vector.broadcast %78 : i32 to vector<2x128xi32>
    %80 = arith.cmpi slt, %79, %5 : vector<2x128xi32>
    %cst_18 = arith.constant 0.000000e+00 : f32
    %81 = vector.broadcast %cst_18 : f32 to vector<2x128xf32>
    %82 = arith.select %80, %77, %81 : vector<2x128xi1>, vector<2x128xf32>
    %83 = arith.select %80, %77, %45 : vector<2x128xi1>, vector<2x128xf32>
    %c4 = arith.constant 4 : index
    %c0_19 = arith.constant 0 : index
    %84 = vector.load %arg1[%c4, %c0_19] : memref<16x384xbf16, #tpu.memory_space<vmem>>, vector<2x384xbf16>
    %85 = arith.truncf %83 : vector<2x128xf32> to vector<2x128xbf16>
    %cst_20 = arith.constant dense<0.000000e+00> : vector<2x384xf32>
    %86 = tpu.matmul %85, %3, %cst_20 {dimension_numbers = #tpu.dot_dimension_numbers<[1], [0], [0], [1], [0, 0, 1, 1], [], []>} : vector<2x128xbf16>, vector<128x384xbf16>, vector<2x384xf32> -> vector<2x384xf32>
    %87 = vector.extract_strided_slice %84 {offsets = [0, 0], sizes = [2, 128], strides = [1, 1]} : vector<2x384xbf16> to vector<2x128xbf16>
    %88 = vector.extract_strided_slice %86 {offsets = [0, 0], sizes = [2, 128], strides = [1, 1]} : vector<2x384xf32> to vector<2x128xf32>
    %89 = arith.extf %87 : vector<2x128xbf16> to vector<2x128xf32>
    %90 = arith.addf %89, %88 : vector<2x128xf32>
    %91 = arith.negf %90 : vector<2x128xf32>
    %92 = math.exp %91 : vector<2x128xf32>
    %cst_21 = arith.constant 1.000000e+00 : f32
    %93 = vector.broadcast %cst_21 : f32 to vector<2x128xf32>
    %94 = arith.addf %93, %92 : vector<2x128xf32>
    %95 = arith.divf %93, %94 : vector<2x128xf32>
    %96 = vector.extract_strided_slice %84 {offsets = [0, 128], sizes = [2, 128], strides = [1, 1]} : vector<2x384xbf16> to vector<2x128xbf16>
    %97 = vector.extract_strided_slice %86 {offsets = [0, 128], sizes = [2, 128], strides = [1, 1]} : vector<2x384xf32> to vector<2x128xf32>
    %98 = arith.extf %96 : vector<2x128xbf16> to vector<2x128xf32>
    %99 = arith.addf %98, %97 : vector<2x128xf32>
    %100 = arith.negf %99 : vector<2x128xf32>
    %101 = math.exp %100 : vector<2x128xf32>
    %cst_22 = arith.constant 1.000000e+00 : f32
    %102 = vector.broadcast %cst_22 : f32 to vector<2x128xf32>
    %103 = arith.addf %102, %101 : vector<2x128xf32>
    %104 = arith.divf %102, %103 : vector<2x128xf32>
    %105 = vector.extract_strided_slice %84 {offsets = [0, 256], sizes = [2, 128], strides = [1, 1]} : vector<2x384xbf16> to vector<2x128xbf16>
    %106 = vector.extract_strided_slice %86 {offsets = [0, 256], sizes = [2, 128], strides = [1, 1]} : vector<2x384xf32> to vector<2x128xf32>
    %107 = vector.broadcast %4 : vector<1x128xf32> to vector<2x128xf32>
    %108 = arith.addf %106, %107 : vector<2x128xf32>
    %109 = arith.mulf %95, %108 : vector<2x128xf32>
    %110 = arith.extf %105 : vector<2x128xbf16> to vector<2x128xf32>
    %111 = arith.addf %110, %109 : vector<2x128xf32>
    %112 = math.tanh %111 : vector<2x128xf32>
    %113 = arith.subf %83, %112 : vector<2x128xf32>
    %114 = arith.mulf %104, %113 : vector<2x128xf32>
    %115 = arith.addf %112, %114 : vector<2x128xf32>
    %c2_i32 = arith.constant 2 : i32
    %116 = arith.addi %6, %c2_i32 : i32
    %117 = vector.broadcast %116 : i32 to vector<2x128xi32>
    %118 = arith.cmpi slt, %117, %5 : vector<2x128xi32>
    %cst_23 = arith.constant 0.000000e+00 : f32
    %119 = vector.broadcast %cst_23 : f32 to vector<2x128xf32>
    %120 = arith.select %118, %115, %119 : vector<2x128xi1>, vector<2x128xf32>
    %121 = arith.select %118, %115, %83 : vector<2x128xi1>, vector<2x128xf32>
    %c6 = arith.constant 6 : index
    %c0_24 = arith.constant 0 : index
    %122 = vector.load %arg1[%c6, %c0_24] : memref<16x384xbf16, #tpu.memory_space<vmem>>, vector<2x384xbf16>
    %123 = arith.truncf %121 : vector<2x128xf32> to vector<2x128xbf16>
    %cst_25 = arith.constant dense<0.000000e+00> : vector<2x384xf32>
    %124 = tpu.matmul %123, %3, %cst_25 {dimension_numbers = #tpu.dot_dimension_numbers<[1], [0], [0], [1], [0, 0, 1, 1], [], []>} : vector<2x128xbf16>, vector<128x384xbf16>, vector<2x384xf32> -> vector<2x384xf32>
    %125 = vector.extract_strided_slice %122 {offsets = [0, 0], sizes = [2, 128], strides = [1, 1]} : vector<2x384xbf16> to vector<2x128xbf16>
    %126 = vector.extract_strided_slice %124 {offsets = [0, 0], sizes = [2, 128], strides = [1, 1]} : vector<2x384xf32> to vector<2x128xf32>
    %127 = arith.extf %125 : vector<2x128xbf16> to vector<2x128xf32>
    %128 = arith.addf %127, %126 : vector<2x128xf32>
    %129 = arith.negf %128 : vector<2x128xf32>
    %130 = math.exp %129 : vector<2x128xf32>
    %cst_26 = arith.constant 1.000000e+00 : f32
    %131 = vector.broadcast %cst_26 : f32 to vector<2x128xf32>
    %132 = arith.addf %131, %130 : vector<2x128xf32>
    %133 = arith.divf %131, %132 : vector<2x128xf32>
    %134 = vector.extract_strided_slice %122 {offsets = [0, 128], sizes = [2, 128], strides = [1, 1]} : vector<2x384xbf16> to vector<2x128xbf16>
    %135 = vector.extract_strided_slice %124 {offsets = [0, 128], sizes = [2, 128], strides = [1, 1]} : vector<2x384xf32> to vector<2x128xf32>
    %136 = arith.extf %134 : vector<2x128xbf16> to vector<2x128xf32>
    %137 = arith.addf %136, %135 : vector<2x128xf32>
    %138 = arith.negf %137 : vector<2x128xf32>
    %139 = math.exp %138 : vector<2x128xf32>
    %cst_27 = arith.constant 1.000000e+00 : f32
    %140 = vector.broadcast %cst_27 : f32 to vector<2x128xf32>
    %141 = arith.addf %140, %139 : vector<2x128xf32>
    %142 = arith.divf %140, %141 : vector<2x128xf32>
    %143 = vector.extract_strided_slice %122 {offsets = [0, 256], sizes = [2, 128], strides = [1, 1]} : vector<2x384xbf16> to vector<2x128xbf16>
    %144 = vector.extract_strided_slice %124 {offsets = [0, 256], sizes = [2, 128], strides = [1, 1]} : vector<2x384xf32> to vector<2x128xf32>
    %145 = vector.broadcast %4 : vector<1x128xf32> to vector<2x128xf32>
    %146 = arith.addf %144, %145 : vector<2x128xf32>
    %147 = arith.mulf %133, %146 : vector<2x128xf32>
    %148 = arith.extf %143 : vector<2x128xbf16> to vector<2x128xf32>
    %149 = arith.addf %148, %147 : vector<2x128xf32>
    %150 = math.tanh %149 : vector<2x128xf32>
    %151 = arith.subf %121, %150 : vector<2x128xf32>
    %152 = arith.mulf %142, %151 : vector<2x128xf32>
    %153 = arith.addf %150, %152 : vector<2x128xf32>
    %c3_i32 = arith.constant 3 : i32
    %154 = arith.addi %6, %c3_i32 : i32
    %155 = vector.broadcast %154 : i32 to vector<2x128xi32>
    %156 = arith.cmpi slt, %155, %5 : vector<2x128xi32>
    %cst_28 = arith.constant 0.000000e+00 : f32
    %157 = vector.broadcast %cst_28 : f32 to vector<2x128xf32>
    %158 = arith.select %156, %153, %157 : vector<2x128xi1>, vector<2x128xf32>
    %159 = arith.select %156, %153, %121 : vector<2x128xi1>, vector<2x128xf32>
    %160 = tpu.concatenate %44, %82, %120, %158 in 0 : vector<2x128xf32>, vector<2x128xf32>, vector<2x128xf32>, vector<2x128xf32> -> vector<8x128xf32>
    %c0_29 = arith.constant 0 : index
    %c0_30 = arith.constant 0 : index
    %161 = vector.load %arg6[%c0_29, %c0_30] : memref<16x128xf32, #tpu.memory_space<vmem>>, vector<8x128xf32>
    tpu.vector_store %arg6[%c0_29, %c0_30], %160 {strides = array<i32>} : memref<16x128xf32, #tpu.memory_space<vmem>>, vector<8x128xf32>,
    %c8 = arith.constant 8 : index
    %c0_31 = arith.constant 0 : index
    %162 = vector.load %arg1[%c8, %c0_31] : memref<16x384xbf16, #tpu.memory_space<vmem>>, vector<2x384xbf16>
    %163 = arith.truncf %159 : vector<2x128xf32> to vector<2x128xbf16>
    %cst_32 = arith.constant dense<0.000000e+00> : vector<2x384xf32>
    %164 = tpu.matmul %163, %3, %cst_32 {dimension_numbers = #tpu.dot_dimension_numbers<[1], [0], [0], [1], [0, 0, 1, 1], [], []>} : vector<2x128xbf16>, vector<128x384xbf16>, vector<2x384xf32> -> vector<2x384xf32>
    %165 = vector.extract_strided_slice %162 {offsets = [0, 0], sizes = [2, 128], strides = [1, 1]} : vector<2x384xbf16> to vector<2x128xbf16>
    %166 = vector.extract_strided_slice %164 {offsets = [0, 0], sizes = [2, 128], strides = [1, 1]} : vector<2x384xf32> to vector<2x128xf32>
    %167 = arith.extf %165 : vector<2x128xbf16> to vector<2x128xf32>
    %168 = arith.addf %167, %166 : vector<2x128xf32>
    %169 = arith.negf %168 : vector<2x128xf32>
    %170 = math.exp %169 : vector<2x128xf32>
    %cst_33 = arith.constant 1.000000e+00 : f32
    %171 = vector.broadcast %cst_33 : f32 to vector<2x128xf32>
    %172 = arith.addf %171, %170 : vector<2x128xf32>
    %173 = arith.divf %171, %172 : vector<2x128xf32>
    %174 = vector.extract_strided_slice %162 {offsets = [0, 128], sizes = [2, 128], strides = [1, 1]} : vector<2x384xbf16> to vector<2x128xbf16>
    %175 = vector.extract_strided_slice %164 {offsets = [0, 128], sizes = [2, 128], strides = [1, 1]} : vector<2x384xf32> to vector<2x128xf32>
    %176 = arith.extf %174 : vector<2x128xbf16> to vector<2x128xf32>
    %177 = arith.addf %176, %175 : vector<2x128xf32>
    %178 = arith.negf %177 : vector<2x128xf32>
    %179 = math.exp %178 : vector<2x128xf32>
    %cst_34 = arith.constant 1.000000e+00 : f32
    %180 = vector.broadcast %cst_34 : f32 to vector<2x128xf32>
    %181 = arith.addf %180, %179 : vector<2x128xf32>
    %182 = arith.divf %180, %181 : vector<2x128xf32>
    %183 = vector.extract_strided_slice %162 {offsets = [0, 256], sizes = [2, 128], strides = [1, 1]} : vector<2x384xbf16> to vector<2x128xbf16>
    %184 = vector.extract_strided_slice %164 {offsets = [0, 256], sizes = [2, 128], strides = [1, 1]} : vector<2x384xf32> to vector<2x128xf32>
    %185 = vector.broadcast %4 : vector<1x128xf32> to vector<2x128xf32>
    %186 = arith.addf %184, %185 : vector<2x128xf32>
    %187 = arith.mulf %173, %186 : vector<2x128xf32>
    %188 = arith.extf %183 : vector<2x128xbf16> to vector<2x128xf32>
    %189 = arith.addf %188, %187 : vector<2x128xf32>
    %190 = math.tanh %189 : vector<2x128xf32>
    %191 = arith.subf %159, %190 : vector<2x128xf32>
    %192 = arith.mulf %182, %191 : vector<2x128xf32>
    %193 = arith.addf %190, %192 : vector<2x128xf32>
    %c4_i32 = arith.constant 4 : i32
    %194 = arith.addi %6, %c4_i32 : i32
    %195 = vector.broadcast %194 : i32 to vector<2x128xi32>
    %196 = arith.cmpi slt, %195, %5 : vector<2x128xi32>
    %cst_35 = arith.constant 0.000000e+00 : f32
    %197 = vector.broadcast %cst_35 : f32 to vector<2x128xf32>
    %198 = arith.select %196, %193, %197 : vector<2x128xi1>, vector<2x128xf32>
    %199 = arith.select %196, %193, %159 : vector<2x128xi1>, vector<2x128xf32>
    %c10 = arith.constant 10 : index
    %c0_36 = arith.constant 0 : index
    %200 = vector.load %arg1[%c10, %c0_36] : memref<16x384xbf16, #tpu.memory_space<vmem>>, vector<2x384xbf16>
    %201 = arith.truncf %199 : vector<2x128xf32> to vector<2x128xbf16>
    %cst_37 = arith.constant dense<0.000000e+00> : vector<2x384xf32>
    %202 = tpu.matmul %201, %3, %cst_37 {dimension_numbers = #tpu.dot_dimension_numbers<[1], [0], [0], [1], [0, 0, 1, 1], [], []>} : vector<2x128xbf16>, vector<128x384xbf16>, vector<2x384xf32> -> vector<2x384xf32>
    %203 = vector.extract_strided_slice %200 {offsets = [0, 0], sizes = [2, 128], strides = [1, 1]} : vector<2x384xbf16> to vector<2x128xbf16>
    %204 = vector.extract_strided_slice %202 {offsets = [0, 0], sizes = [2, 128], strides = [1, 1]} : vector<2x384xf32> to vector<2x128xf32>
    %205 = arith.extf %203 : vector<2x128xbf16> to vector<2x128xf32>
    %206 = arith.addf %205, %204 : vector<2x128xf32>
    %207 = arith.negf %206 : vector<2x128xf32>
    %208 = math.exp %207 : vector<2x128xf32>
    %cst_38 = arith.constant 1.000000e+00 : f32
    %209 = vector.broadcast %cst_38 : f32 to vector<2x128xf32>
    %210 = arith.addf %209, %208 : vector<2x128xf32>
    %211 = arith.divf %209, %210 : vector<2x128xf32>
    %212 = vector.extract_strided_slice %200 {offsets = [0, 128], sizes = [2, 128], strides = [1, 1]} : vector<2x384xbf16> to vector<2x128xbf16>
    %213 = vector.extract_strided_slice %202 {offsets = [0, 128], sizes = [2, 128], strides = [1, 1]} : vector<2x384xf32> to vector<2x128xf32>
    %214 = arith.extf %212 : vector<2x128xbf16> to vector<2x128xf32>
    %215 = arith.addf %214, %213 : vector<2x128xf32>
    %216 = arith.negf %215 : vector<2x128xf32>
    %217 = math.exp %216 : vector<2x128xf32>
    %cst_39 = arith.constant 1.000000e+00 : f32
    %218 = vector.broadcast %cst_39 : f32 to vector<2x128xf32>
    %219 = arith.addf %218, %217 : vector<2x128xf32>
    %220 = arith.divf %218, %219 : vector<2x128xf32>
    %221 = vector.extract_strided_slice %200 {offsets = [0, 256], sizes = [2, 128], strides = [1, 1]} : vector<2x384xbf16> to vector<2x128xbf16>
    %222 = vector.extract_strided_slice %202 {offsets = [0, 256], sizes = [2, 128], strides = [1, 1]} : vector<2x384xf32> to vector<2x128xf32>
    %223 = vector.broadcast %4 : vector<1x128xf32> to vector<2x128xf32>
    %224 = arith.addf %222, %223 : vector<2x128xf32>
    %225 = arith.mulf %211, %224 : vector<2x128xf32>
    %226 = arith.extf %221 : vector<2x128xbf16> to vector<2x128xf32>
    %227 = arith.addf %226, %225 : vector<2x128xf32>
    %228 = math.tanh %227 : vector<2x128xf32>
    %229 = arith.subf %199, %228 : vector<2x128xf32>
    %230 = arith.mulf %220, %229 : vector<2x128xf32>
    %231 = arith.addf %228, %230 : vector<2x128xf32>
    %c5_i32 = arith.constant 5 : i32
    %232 = arith.addi %6, %c5_i32 : i32
    %233 = vector.broadcast %232 : i32 to vector<2x128xi32>
    %234 = arith.cmpi slt, %233, %5 : vector<2x128xi32>
    %cst_40 = arith.constant 0.000000e+00 : f32
    %235 = vector.broadcast %cst_40 : f32 to vector<2x128xf32>
    %236 = arith.select %234, %231, %235 : vector<2x128xi1>, vector<2x128xf32>
    %237 = arith.select %234, %231, %199 : vector<2x128xi1>, vector<2x128xf32>
    %c12 = arith.constant 12 : index
    %c0_41 = arith.constant 0 : index
    %238 = vector.load %arg1[%c12, %c0_41] : memref<16x384xbf16, #tpu.memory_space<vmem>>, vector<2x384xbf16>
    %239 = arith.truncf %237 : vector<2x128xf32> to vector<2x128xbf16>
    %cst_42 = arith.constant dense<0.000000e+00> : vector<2x384xf32>
    %240 = tpu.matmul %239, %3, %cst_42 {dimension_numbers = #tpu.dot_dimension_numbers<[1], [0], [0], [1], [0, 0, 1, 1], [], []>} : vector<2x128xbf16>, vector<128x384xbf16>, vector<2x384xf32> -> vector<2x384xf32>
    %241 = vector.extract_strided_slice %238 {offsets = [0, 0], sizes = [2, 128], strides = [1, 1]} : vector<2x384xbf16> to vector<2x128xbf16>
    %242 = vector.extract_strided_slice %240 {offsets = [0, 0], sizes = [2, 128], strides = [1, 1]} : vector<2x384xf32> to vector<2x128xf32>
    %243 = arith.extf %241 : vector<2x128xbf16> to vector<2x128xf32>
    %244 = arith.addf %243, %242 : vector<2x128xf32>
    %245 = arith.negf %244 : vector<2x128xf32>
    %246 = math.exp %245 : vector<2x128xf32>
    %cst_43 = arith.constant 1.000000e+00 : f32
    %247 = vector.broadcast %cst_43 : f32 to vector<2x128xf32>
    %248 = arith.addf %247, %246 : vector<2x128xf32>
    %249 = arith.divf %247, %248 : vector<2x128xf32>
    %250 = vector.extract_strided_slice %238 {offsets = [0, 128], sizes = [2, 128], strides = [1, 1]} : vector<2x384xbf16> to vector<2x128xbf16>
    %251 = vector.extract_strided_slice %240 {offsets = [0, 128], sizes = [2, 128], strides = [1, 1]} : vector<2x384xf32> to vector<2x128xf32>
    %252 = arith.extf %250 : vector<2x128xbf16> to vector<2x128xf32>
    %253 = arith.addf %252, %251 : vector<2x128xf32>
    %254 = arith.negf %253 : vector<2x128xf32>
    %255 = math.exp %254 : vector<2x128xf32>
    %cst_44 = arith.constant 1.000000e+00 : f32
    %256 = vector.broadcast %cst_44 : f32 to vector<2x128xf32>
    %257 = arith.addf %256, %255 : vector<2x128xf32>
    %258 = arith.divf %256, %257 : vector<2x128xf32>
    %259 = vector.extract_strided_slice %238 {offsets = [0, 256], sizes = [2, 128], strides = [1, 1]} : vector<2x384xbf16> to vector<2x128xbf16>
    %260 = vector.extract_strided_slice %240 {offsets = [0, 256], sizes = [2, 128], strides = [1, 1]} : vector<2x384xf32> to vector<2x128xf32>
    %261 = vector.broadcast %4 : vector<1x128xf32> to vector<2x128xf32>
    %262 = arith.addf %260, %261 : vector<2x128xf32>
    %263 = arith.mulf %249, %262 : vector<2x128xf32>
    %264 = arith.extf %259 : vector<2x128xbf16> to vector<2x128xf32>
    %265 = arith.addf %264, %263 : vector<2x128xf32>
    %266 = math.tanh %265 : vector<2x128xf32>
    %267 = arith.subf %237, %266 : vector<2x128xf32>
    %268 = arith.mulf %258, %267 : vector<2x128xf32>
    %269 = arith.addf %266, %268 : vector<2x128xf32>
    %c6_i32 = arith.constant 6 : i32
    %270 = arith.addi %6, %c6_i32 : i32
    %271 = vector.broadcast %270 : i32 to vector<2x128xi32>
    %272 = arith.cmpi slt, %271, %5 : vector<2x128xi32>
    %cst_45 = arith.constant 0.000000e+00 : f32
    %273 = vector.broadcast %cst_45 : f32 to vector<2x128xf32>
    %274 = arith.select %272, %269, %273 : vector<2x128xi1>, vector<2x128xf32>
    %275 = arith.select %272, %269, %237 : vector<2x128xi1>, vector<2x128xf32>
    %c14 = arith.constant 14 : index
    %c0_46 = arith.constant 0 : index
    %276 = vector.load %arg1[%c14, %c0_46] : memref<16x384xbf16, #tpu.memory_space<vmem>>, vector<2x384xbf16>
    %277 = arith.truncf %275 : vector<2x128xf32> to vector<2x128xbf16>
    %cst_47 = arith.constant dense<0.000000e+00> : vector<2x384xf32>
    %278 = tpu.matmul %277, %3, %cst_47 {dimension_numbers = #tpu.dot_dimension_numbers<[1], [0], [0], [1], [0, 0, 1, 1], [], []>} : vector<2x128xbf16>, vector<128x384xbf16>, vector<2x384xf32> -> vector<2x384xf32>
    %279 = vector.extract_strided_slice %276 {offsets = [0, 0], sizes = [2, 128], strides = [1, 1]} : vector<2x384xbf16> to vector<2x128xbf16>
    %280 = vector.extract_strided_slice %278 {offsets = [0, 0], sizes = [2, 128], strides = [1, 1]} : vector<2x384xf32> to vector<2x128xf32>
    %281 = arith.extf %279 : vector<2x128xbf16> to vector<2x128xf32>
    %282 = arith.addf %281, %280 : vector<2x128xf32>
    %283 = arith.negf %282 : vector<2x128xf32>
    %284 = math.exp %283 : vector<2x128xf32>
    %cst_48 = arith.constant 1.000000e+00 : f32
    %285 = vector.broadcast %cst_48 : f32 to vector<2x128xf32>
    %286 = arith.addf %285, %284 : vector<2x128xf32>
    %287 = arith.divf %285, %286 : vector<2x128xf32>
    %288 = vector.extract_strided_slice %276 {offsets = [0, 128], sizes = [2, 128], strides = [1, 1]} : vector<2x384xbf16> to vector<2x128xbf16>
    %289 = vector.extract_strided_slice %278 {offsets = [0, 128], sizes = [2, 128], strides = [1, 1]} : vector<2x384xf32> to vector<2x128xf32>
    %290 = arith.extf %288 : vector<2x128xbf16> to vector<2x128xf32>
    %291 = arith.addf %290, %289 : vector<2x128xf32>
    %292 = arith.negf %291 : vector<2x128xf32>
    %293 = math.exp %292 : vector<2x128xf32>
    %cst_49 = arith.constant 1.000000e+00 : f32
    %294 = vector.broadcast %cst_49 : f32 to vector<2x128xf32>
    %295 = arith.addf %294, %293 : vector<2x128xf32>
    %296 = arith.divf %294, %295 : vector<2x128xf32>
    %297 = vector.extract_strided_slice %276 {offsets = [0, 256], sizes = [2, 128], strides = [1, 1]} : vector<2x384xbf16> to vector<2x128xbf16>
    %298 = vector.extract_strided_slice %278 {offsets = [0, 256], sizes = [2, 128], strides = [1, 1]} : vector<2x384xf32> to vector<2x128xf32>
    %299 = vector.broadcast %4 : vector<1x128xf32> to vector<2x128xf32>
    %300 = arith.addf %298, %299 : vector<2x128xf32>
    %301 = arith.mulf %287, %300 : vector<2x128xf32>
    %302 = arith.extf %297 : vector<2x128xbf16> to vector<2x128xf32>
    %303 = arith.addf %302, %301 : vector<2x128xf32>
    %304 = math.tanh %303 : vector<2x128xf32>
    %305 = arith.subf %275, %304 : vector<2x128xf32>
    %306 = arith.mulf %296, %305 : vector<2x128xf32>
    %307 = arith.addf %304, %306 : vector<2x128xf32>
    %c7_i32 = arith.constant 7 : i32
    %308 = arith.addi %6, %c7_i32 : i32
    %309 = vector.broadcast %308 : i32 to vector<2x128xi32>
    %310 = arith.cmpi slt, %309, %5 : vector<2x128xi32>
    %cst_50 = arith.constant 0.000000e+00 : f32
    %311 = vector.broadcast %cst_50 : f32 to vector<2x128xf32>
    %312 = arith.select %310, %307, %311 : vector<2x128xi1>, vector<2x128xf32>
    %313 = arith.select %310, %307, %275 : vector<2x128xi1>, vector<2x128xf32>
    %314 = tpu.concatenate %198, %236, %274, %312 in 0 : vector<2x128xf32>, vector<2x128xf32>, vector<2x128xf32>, vector<2x128xf32> -> vector<8x128xf32>
    %c8_51 = arith.constant 8 : index
    %c0_52 = arith.constant 0 : index
    %315 = vector.load %arg6[%c8_51, %c0_52] : memref<16x128xf32, #tpu.memory_space<vmem>>, vector<8x128xf32>
    tpu.vector_store %arg6[%c8_51, %c0_52], %314 {strides = array<i32>} : memref<16x128xf32, #tpu.memory_space<vmem>>, vector<8x128xf32>,
    %c0_53 = arith.constant 0 : index
    %c0_54 = arith.constant 0 : index
    %316 = vector.load %arg7[%c0_53, %c0_54] : memref<2x128xf32, #tpu.memory_space<vmem>>, vector<2x128xf32>
    tpu.vector_store %arg7[%c0_53, %c0_54], %313 {strides = array<i32>} : memref<2x128xf32, #tpu.memory_space<vmem>>, vector<2x128xf32>,
    return
  }
  func.func @transform_0(%arg0: i32) -> (i32, i32) {
    %c0_i32 = arith.constant 0 : i32
    %c0_i32_0 = arith.constant 0 : i32
    return %arg0, %c0_i32 : i32, i32
  }
  func.func @transform_1(%arg0: i32) -> (i32, i32) {
    %c0_i32 = arith.constant 0 : i32
    %c0_i32_0 = arith.constant 0 : i32
    %c0_i32_1 = arith.constant 0 : i32
    return %c0_i32, %c0_i32_0 : i32, i32
  }
  func.func @transform_2(%arg0: i32) -> (i32, i32) {
    %c0_i32 = arith.constant 0 : i32
    %c0_i32_0 = arith.constant 0 : i32
    %c0_i32_1 = arith.constant 0 : i32
    return %c0_i32, %c0_i32_0 : i32, i32
  }
  func.func @transform_3(%arg0: i32) -> (i32, i32) {
    %c0_i32 = arith.constant 0 : i32
    %c0_i32_0 = arith.constant 0 : i32
    %c0_i32_1 = arith.constant 0 : i32
    return %c0_i32, %c0_i32_0 : i32, i32
  }
  func.func @transform_4(%arg0: i32) -> (i32, i32) {
    %c0_i32 = arith.constant 0 : i32
    %c0_i32_0 = arith.constant 0 : i32
    %c0_i32_1 = arith.constant 0 : i32
    return %c0_i32, %c0_i32_0 : i32, i32
  }
  func.func @transform_5(%arg0: i32) -> (i32, i32) {
    %c0_i32 = arith.constant 0 : i32
    %c0_i32_0 = arith.constant 0 : i32
    return %arg0, %c0_i32 : i32, i32
  }
}

</mosaic_0001>

<bundles_post_ra>
// kernel: tpu_custom_call.1
= control target key start
LH: loop header
LB: loop body
LE: loop exit
PB: predicated region body
PF: predicated region fallthrough
CT: control target
= control target key end

     0   :  { %10 = vsyncpa [#allocation4], 0  ;;  %s2286_s0 = inlined_call_operand.hbm [shape: bf16[16,384], index: 0, kind: input, shape index: {}]   ;;  %s2287_s1 = inlined_call_operand.hbm [shape: f32[2,128], index: 1, kind: input, shape index: {}]   ;;  %s2288_s2 = inlined_call_operand.hbm [shape: bf16[128,384], index: 2, kind: input, shape index: {}]   ;;  %s2289_s3 = inlined_call_operand.vmem [shape: f32[1,128], index: 3, kind: input, shape index: {}]   ;;  %s2290_s4 = inlined_call_operand.vmem [shape: s32[2,128], index: 4, kind: input, shape index: {}]   ;;  %s2291_s5 = inlined_call_operand.hbm [shape: f32[16,128], index: 5, kind: output, shape index: {}]  }
   0x1   :  { %11 = vsyncpa [#allocation7], 0 }
   0x2   :  { %12 = vsyncpa [#allocation5], 0  ;;  %s1836_s18 = smov [#allocation6]   ;;  %s1837_s20 = smov [#allocation3]  }
   0x3   :  { %s31_s19 = sshll.u32 %s1836_s18, 4  ;;  %s18_s21 = sshll.u32 %s1837_s20, 4  ;;  %s32_s19 = int_to_ptr.vmem [resolvable:$true] %s31_s19  ;;  %s19_s21 = int_to_ptr.vmem [resolvable:$true] %s18_s21 }
   0x4   :  { %s1758_s22 = scalar_lea.vmem %s32_s19, 32  ;;  %p1763_p1 = scmp.lt.s32.totalorder %s32_s19, %s32_s19 }
   0x5   :  { %p1759_p0 = scmp.ne.s32.totalorder %s32_s19, %s1758_s22  ;;  %p1764_p2 = scmp.lt.s32.totalorder %s1758_s22, %s1758_s22 }
   0x7   :  { %p1765_p3 = por %p1764_p2, %p1763_p1 }
   0x9   :  { %p1766_p4 = pnand %p1765_p3, %p1759_p0 }
   0xb   :  { %1769 = shalt.err (!%p1766_p4)
}
   0xc   :  { %34 = dma.hbm_to_vmem [thread:$0]  %s2287_s1, 32, %s32_s19, [#allocation7]  }
   0xd   :  { %s1778_s25 = scalar_lea.vmem %s19_s21, 384  ;;  %p1783_p6 = scmp.lt.s32.totalorder %s19_s21, %s19_s21 }
   0xe   :  { %p1779_p5 = scmp.ne.s32.totalorder %s19_s21, %s1778_s25  ;;  %p1784_p7 = scmp.lt.s32.totalorder %s1778_s25, %s1778_s25 }
  0x10   :  { %p1785_p8 = por %p1784_p7, %p1783_p6 }
  0x12   :  { %p1786_p9 = pnand %p1785_p8, %p1779_p5 }
  0x14   :  { %1789 = shalt.err (!%p1786_p9)
}
  0x15   :  { %s1838_s26 = smov 192   ;;  %s1839_s27 = smov 12  }
  0x16   :  { %24 = dma.hbm_to_vmem [thread:$0]  %s2286_s0, 384, %s19_s21, [#allocation4], %s1838_s26, %s1838_s26, %s1839_s27  }
  0x17   :  { %s1840_s30 = smov [#allocation8]  }
  0x18   :  { %s40_s6 = sshll.u32 %s1840_s30, 4  ;;  %s41_s6 = int_to_ptr.vmem [resolvable:$true] %s40_s6 }
  0x19   :  { %s1798_s7 = scalar_lea.vmem %s41_s6, 3072  ;;  %p1803_p11 = scmp.lt.s32.totalorder %s41_s6, %s41_s6 }
  0x1a   :  { %p1799_p10 = scmp.ne.s32.totalorder %s41_s6, %s1798_s7  ;;  %p1804_p12 = scmp.lt.s32.totalorder %s1798_s7, %s1798_s7 }
  0x1c   :  { %p1805_p13 = por %p1804_p12, %p1803_p11 }
  0x1e   :  { %p1806_p0 = pnand %p1805_p13, %p1799_p10 }
  0x20   :  { %1809 = shalt.err (!%p1806_p0)
}
  0x21   :  { %46 = dma.hbm_to_vmem [thread:$0]  %s2288_s2, 3072, %s41_s6, [#allocation7], %s1838_s26, %s1838_s26, %s1839_s27  }
  0x22   :  { %1830 = dma.done.wait [#allocation4], 384  }
  0x23   :  { %1831 = vsyncadd [#allocation4], 4294966912 }
  0x24   :  { %1832 = dma.done.wait [#allocation7], 3104  }
  0x25   :  { %1833 = vsyncadd [#allocation7], 4294964192  ;;  %v1841_v0 = vmov 0.0   ;;  %v1842_v1 = vmov 0   ;;  %vm1843_vm0 = vmmov 0   ;;  %vm763_vm3 = vcmask 1041408  }
  0x26   :  { %1441 = vmatprep.subr.bf16.mxu1 %v1841_v0  ;;  %266 = vmatprep.mubr.bf16.mxu0 %v1842_v1  ;;  %v1890_v2 = vld [vmem:[#allocation8 + $0xac] ss:$12 sps:$4 sm:$0xff]   ;;  %v1892_v3 = vld [vmem:[#allocation8 + $0xa8] ss:$12 sps:$4 sm:$0xff]   ;;  %v1898_v5 = vld [vmem:[#allocation8 + $0x90] ss:$12 sps:$4 sm:$0xff]  }
  0x27   :  { %1457 = vmatprep.mubr.msk.bf16.mxu1 %vm1843_vm0, %v1841_v0  ;;  %234 = vmatprep.subr.bf16.mxu0 %v1890_v2  ;;  %v1895_v4 = vld [vmem:[#allocation8 + $0x94] ss:$12 sps:$4 sm:$0xff]   ;;  %v1901_v6 = vld [vmem:[#allocation8 + $0x7c] ss:$12 sps:$4 sm:$0xff]   ;;  %v1904_v7 = vld [vmem:[#allocation8 + $0x78] ss:$12 sps:$4 sm:$0xff]  }
  0x28   :  { %235 = vmatpush1.bf16.msra.mxu0 %v1892_v3  ;;  %v1907_v8 = vld [vmem:[#allocation8 + $0x64] ss:$12 sps:$4 sm:$0xff]   ;;  %v1912_v10 = vld [vmem:[#allocation8 + $0x60] ss:$12 sps:$4 sm:$0xff]   ;;  %v65_v13 = vld [vmem:[#allocation6] sm:$0x3] }
  0x29   :  { %236 = vmatprep.subr.bf16.mxu0 %v1895_v4  ;;  %v1909_v9 = vld [vmem:[#allocation8 + $0xb0] ss:$12 sps:$4 sm:$0xff]   ;;  %v1914_v11 = vld [vmem:[#allocation8 + $0x4c] ss:$12 sps:$4 sm:$0xff]   ;;  %66 = vst [vmem:[#allocation2] sm:$0x3] %v65_v13 }
  0x2a   :  { %1442 = vmatpush3.bf16.msra.mxu1 %v1909_v9  ;;  %v1918_v12 = vld [vmem:[#allocation8 + $0x98] ss:$12 sps:$4 sm:$0xff]   ;;  %v1921_v14 = vld [vmem:[#allocation8 + $0x48] ss:$12 sps:$4 sm:$0xff]   ;;  %v1928_v16 = vld [vmem:[#allocation8 + $0x80] ss:$12 sps:$4 sm:$0xff]  }
  0x2b   :  { %1443 = vmatprep.subr.bf16.mxu1 %v1841_v0  ;;  %v1924_v15 = vld [vmem:[#allocation8 + $0x34] ss:$12 sps:$4 sm:$0xff]   ;;  %v1932_v17 = vld [vmem:[#allocation8 + $0x30] ss:$12 sps:$4 sm:$0xff]   ;;  %v1942_v20 = vld [vmem:[#allocation8 + $0x18] ss:$12 sps:$4 sm:$0xff]  }
  0x2c   :  { %237 = vmatpush1.bf16.msra.mxu0 %v1898_v5  ;;  %v1935_v18 = vld [vmem:[#allocation8 + $0x1c] ss:$12 sps:$4 sm:$0xff]   ;;  %v1945_v21 = vld [vmem:[#allocation8 + $0x4] ss:$12 sps:$4 sm:$0xff]   ;;  %v1952_v23 = vld [vmem:[#allocation8] ss:$12 sps:$4 sm:$0xff]  }
  0x2d   :  { %238 = vmatprep.subr.bf16.mxu0 %v1901_v6  ;;  %v1938_v19 = vld [vmem:[#allocation8 + $0x68] ss:$12 sps:$4 sm:$0xff]   ;;  %v1948_v22 = vld [vmem:[#allocation8 + $0x50] ss:$12 sps:$4 sm:$0xff]   ;;  %v1958_v25 = vld [vmem:[#allocation8 + $0x38] ss:$12 sps:$4 sm:$0xff]  }
  0x2e   :  { %1444 = vmatpush3.bf16.msra.mxu1 %v1918_v12  ;;  %v1965_v27 = vld [vmem:[#allocation8 + $0x20] ss:$12 sps:$4 sm:$0xff]   ;;  %v1972_v28 = vld [vmem:[#allocation8 + $0x8] ss:$12 sps:$4 sm:$0xff]   ;;  %v2013_v47 = vld [vmem:[%s2289_s3] ss:$0 sm:$0xff] }
  0x2f   :  { %1445 = vmatprep.subr.bf16.mxu1 %v1841_v0  ;;  %v103_v29 = vld [vmem:[#allocation3] sm:$0x11]  ;;  %v104_v48 = vld [vmem:[#allocation3 + $0x8] sm:$0x1]  ;;  %v2019_v57 = vld [vmem:[%s2290_s4] sm:$0x3] }
  0x30   :  { %239 = vmatpush1.bf16.msra.mxu0 %v1904_v7  ;;  %v1954_v24 = vld [vmem:[#allocation2] sm:$0x3]  ;;  %v315_v30 = vunpack.c.l.bf16 %v103_v29  ;;  %v324_v35 = vrot.slane %v103_v29, 4  ;;  %v342_v51 = vunpack.c.l.bf16 %v104_v48  ;;  %vm1347_vm1 = vcmp.gt.s32.totalorder %v2019_v57, 0  ;;  %s1844_s14 = smov [#allocation9]  }
  0x31   :  { %240 = vmatprep.subr.bf16.mxu0 %v1907_v8  ;;  %v105_v26 = vpack.c.bf16 %v1954_v24, %v1954_v24  ;;  %vm1350_vm2 = vcmp.gt.s32.totalorder %v2019_v57, 1  ;;  %vm1353_vm4 = vcmp.gt.s32.totalorder %v2019_v57, 2  ;;  %vm765_vm5 = vcmask 1043456   ;;  %s1307_s15 = sshll.u32 %s1844_s14, 4  ;;  %s1308_s15 = int_to_ptr.vmem [resolvable:$true] %s1307_s15 }
  0x32   :  { %1446 = vmatpush3.bf16.msra.mxu1 %v1928_v16  ;;  %v326_v38 = vunpack.c.l.bf16 %v324_v35  ;;  %vm1356_vm6 = vcmp.gt.s32.totalorder %v2019_v57, 3  ;;  %vm767_vm7 = vcmask 1045504   ;;  %vm1359_vm8 = vcmp.gt.s32.totalorder %v2019_v57, 4  ;;  %s1810_s16 = scalar_lea.vmem %s1308_s15, 256  ;;  %p1815_p2 = scmp.lt.s32.totalorder %s1308_s15, %s1308_s15 }
  0x33   :  { %1447 = vmatprep.subr.bf16.mxu1 %v1841_v0  ;;  %vm1362_vm9 = vcmp.gt.s32.totalorder %v2019_v57, 5  ;;  %vm1365_vm10 = vcmp.gt.s32.totalorder %v2019_v57, 6  ;;  %p1811_p1 = scmp.ne.s32.totalorder %s1308_s15, %s1810_s16  ;;  %p1816_p3 = scmp.lt.s32.totalorder %s1810_s16, %s1810_s16 }
  0x34   :  { %241 = vmatpush1.bf16.msra.mxu0 %v1912_v10 }
  0x35   :  { %242 = vmatprep.subr.bf16.mxu0 %v1914_v11  ;;  %p1817_p4 = por %p1816_p3, %p1815_p2 }
  0x36   :  { %1448 = vmatpush3.bf16.msra.mxu1 %v1938_v19 }
  0x37   :  { %1449 = vmatprep.subr.bf16.mxu1 %v1841_v0  ;;  %p1818_p5 = pnand %p1817_p4, %p1811_p1 }
  0x38   :  { %243 = vmatpush1.bf16.msra.mxu0 %v1921_v14 }
  0x39   :  { %244 = vmatprep.subr.bf16.mxu0 %v1924_v15 }
  0x3a   :  { %1450 = vmatpush3.bf16.msra.mxu1 %v1948_v22 }
  0x3b   :  { %1451 = vmatprep.subr.bf16.mxu1 %v1841_v0 }
  0x3c   :  { %245 = vmatpush1.bf16.msra.mxu0 %v1932_v17 }
  0x3d   :  { %246 = vmatprep.subr.bf16.mxu0 %v1935_v18 }
  0x3e   :  { %1452 = vmatpush3.bf16.msra.mxu1 %v1958_v25 }
  0x3f   :  { %1453 = vmatprep.subr.bf16.mxu1 %v1841_v0 }
  0x40   :  { %247 = vmatpush1.bf16.msra.mxu0 %v1942_v20 }
  0x41   :  { %248 = vmatprep.subr.bf16.mxu0 %v1945_v21 }
  0x42   :  { %1454 = vmatpush3.bf16.msra.mxu1 %v1965_v27 }
  0x43   :  { %1455 = vmatprep.subr.bf16.mxu1 %v1841_v0 }
  0x44   :  { %249 = vmatpush1.bf16.msra.mxu0 %v1952_v23 }
  0x45   :  { %355 = vmatprep.subr.bf16.mxu0 %v1890_v2 }
  0x46   :  { %1456 = vmatpush3.bf16.msra.mxu1 %v1972_v28 }
  0x47   :  { %267 = vmatmul.mubr.bf16.vlgmr.msra.gmra.mxu0 %v105_v26  ;;  %1461 = vmatprep.subr.bf16.mxu1 %v1841_v0 }
  0x48   :  { %356 = vmatpush1.bf16.msra.mxu0 %v1892_v3  ;;  %387 = vmatprep.mubr.bf16.mxu0 %v1842_v1 }
  0x49   :  { %357 = vmatprep.subr.bf16.mxu0 %v1895_v4  ;;  %1458 = vmatmul.mubr.bf16.vlgmr.msra.gmra.mxu1 %v105_v26 }
  0x4a   :  { %1462 = vmatpush3.bf16.msra.mxu1 %v1909_v9  ;;  %1477 = vmatprep.mubr.msk.bf16.mxu1 %vm1843_vm0, %v1841_v0 }
  0x4b   :  { %1463 = vmatprep.subr.bf16.mxu1 %v1841_v0 }
  0x4c   :  { %358 = vmatpush1.bf16.msra.mxu0 %v1898_v5 }
  0x4d   :  { %359 = vmatprep.subr.bf16.mxu0 %v1901_v6 }
  0x4e   :  { %1464 = vmatpush3.bf16.msra.mxu1 %v1918_v12 }
  0x4f   :  { %1465 = vmatprep.subr.bf16.mxu1 %v1841_v0 }
  0x50   :  { %360 = vmatpush1.bf16.msra.mxu0 %v1904_v7 }
  0x51   :  { %361 = vmatprep.subr.bf16.mxu0 %v1907_v8 }
  0x52   :  { %1466 = vmatpush3.bf16.msra.mxu1 %v1928_v16 }
  0x53   :  { %1467 = vmatprep.subr.bf16.mxu1 %v1841_v0 }
  0x54   :  { %362 = vmatpush1.bf16.msra.mxu0 %v1912_v10 }
  0x55   :  { %363 = vmatprep.subr.bf16.mxu0 %v1914_v11 }
  0x56   :  { %1468 = vmatpush3.bf16.msra.mxu1 %v1938_v19 }
  0x57   :  { %1469 = vmatprep.subr.bf16.mxu1 %v1841_v0 }
  0x58   :  { %364 = vmatpush1.bf16.msra.mxu0 %v1921_v14 }
  0x59   :  { %365 = vmatprep.subr.bf16.mxu0 %v1924_v15 }
  0x5a   :  { %1470 = vmatpush3.bf16.msra.mxu1 %v1948_v22 }
  0x5b   :  { %1471 = vmatprep.subr.bf16.mxu1 %v1841_v0 }
  0x5c   :  { %366 = vmatpush1.bf16.msra.mxu0 %v1932_v17 }
  0x5d   :  { %367 = vmatprep.subr.bf16.mxu0 %v1935_v18 }
  0x5e   :  { %1472 = vmatpush3.bf16.msra.mxu1 %v1958_v25 }
  0x5f   :  { %1473 = vmatprep.subr.bf16.mxu1 %v1841_v0 }
  0x60   :  { %368 = vmatpush1.bf16.msra.mxu0 %v1942_v20 }
  0x61   :  { %369 = vmatprep.subr.bf16.mxu0 %v1945_v21 }
  0x62   :  { %1474 = vmatpush3.bf16.msra.mxu1 %v1965_v27 }
  0x63   :  { %1475 = vmatprep.subr.bf16.mxu1 %v1841_v0 }
  0x64   :  { %370 = vmatpush1.bf16.msra.mxu0 %v1952_v23 }
  0x65   :  { %489 = vmatprep.subr.bf16.mxu0 %v1890_v2 }
  0x66   :  { %1476 = vmatpush3.bf16.msra.mxu1 %v1972_v28 }
  0x67   :  { %1481 = vmatprep.subr.bf16.mxu1 %v1841_v0 }
 0x107   :  { %v268_v31 = vpop.f32.mrf.mxu0 }
 0x108   :  { %v316_v32 = vadd.f32 %v315_v30, %v268_v31 }
 0x109   :  { %v270_v33 = vpop.f32.mrf.mxu0  ;;  %v309_v39 = vpop.f32.mrf.mxu1 }
 0x10a   :  { %v1344_v34 = vmul.f32 -1.442695, %v316_v32  ;;  %v327_v41 = vadd.f32 %v326_v38, %v270_v33  ;;  %v340_v49 = vadd.f32 %v2013_v47, %v309_v39 }
 0x10b   :  { %v272_v36 = vpop.f32.mrf.mxu0  ;;  %v1459_v40 = vpop.f32.mrf.mxu1 }
 0x10c   :  { %1644 = vpow2.f32 %v1344_v34  ;;  %v1345_v44 = vmul.f32 -1.442695, %v327_v41 }
 0x10d   :  { %v273_v37 = vpop.f32.mrf.mxu0  ;;  %v312_v42 = vpop.f32.mrf.mxu1 }
 0x10e   :  { %1646 = vpow2.f32 %v1345_v44 }
 0x10f   :  { %v1460_v43 = vpop.f32.mrf.mxu1 }
 0x119   :  { %v1645_v45 = vpop.eup %1644 }
 0x11a   :  { %v320_v46 = vadd.f32 1.0, %v1645_v45 }
 0x11b   :  { %v1647_v50 = vpop.eup %1646 }
 0x11c   :  { %1648 = vrcp.f32 %v320_v46  ;;  %v331_v54 = vadd.f32 1.0, %v1647_v50 }
 0x129   :  { %v1649_v52 = vpop.eup %1648 }
 0x12a   :  { %v341_v53 = vmul.f32 %v1649_v52, %v340_v49  ;;  %v353_v49 = vld [vmem:[#allocation3 + $0x8] sm:$0x2] }
 0x12c   :  { %v343_v55 = vadd.f32 %v342_v51, %v341_v53  ;;  %v466_v51 = vunpack.c.l.bf16 %v353_v49 }
 0x12e   :  { %1650 = vtanh.f32 %v343_v55 }
 0x12f   :  { %1652 = vrcp.f32 %v331_v54 }
 0x13b   :  { %v1651_v56 = vpop.eup %1650 }
 0x13c   :  { %v345_v58 = vsub.f32 %v1954_v24, %v1651_v56  ;;  %v1653_v59 = vpop.eup %1652 }
 0x13e   :  { %v346_v60 = vmul.f32 %v1653_v59, %v345_v58 }
 0x140   :  { %v347_v61 = vadd.f32 %v1651_v56, %v346_v60 }
 0x142   :  { %v2023_v62 = vsel %vm1347_vm1, %v347_v61, 0.0  ;;  %v2026_v63 = vsel %vm1347_vm1, %v347_v61, %v1954_v24  ;;  %v352_v24 = vld [vmem:[#allocation3] sm:$0x22] }
 0x143   :  { %v354_v13 = vpack.c.bf16 %v2026_v63, %v2026_v63  ;;  %v436_v26 = vunpack.c.l.bf16 %v352_v24  ;;  %v448_v40 = vrot.slane %v352_v24, 4 }
 0x145   :  { %388 = vmatmul.mubr.bf16.vlgmr.msra.gmra.mxu0 %v354_v13  ;;  %1478 = vmatmul.mubr.bf16.vlgmr.msra.gmra.mxu1 %v354_v13  ;;  %v450_v41 = vunpack.c.l.bf16 %v448_v40 }
 0x146   :  { %490 = vmatpush1.bf16.msra.mxu0 %v1892_v3  ;;  %1482 = vmatpush3.bf16.msra.mxu1 %v1909_v9 }
 0x147   :  { %491 = vmatprep.subr.bf16.mxu0 %v1895_v4  ;;  %1483 = vmatprep.subr.bf16.mxu1 %v1841_v0 }
 0x148   :  { %521 = vmatprep.mubr.bf16.mxu0 %v1842_v1  ;;  %1497 = vmatprep.mubr.msk.bf16.mxu1 %vm1843_vm0, %v1841_v0 }
 0x14a   :  { %492 = vmatpush1.bf16.msra.mxu0 %v1898_v5  ;;  %1484 = vmatpush3.bf16.msra.mxu1 %v1918_v12 }
 0x14b   :  { %493 = vmatprep.subr.bf16.mxu0 %v1901_v6  ;;  %1485 = vmatprep.subr.bf16.mxu1 %v1841_v0 }
 0x14e   :  { %494 = vmatpush1.bf16.msra.mxu0 %v1904_v7  ;;  %1486 = vmatpush3.bf16.msra.mxu1 %v1928_v16 }
 0x14f   :  { %495 = vmatprep.subr.bf16.mxu0 %v1907_v8  ;;  %1487 = vmatprep.subr.bf16.mxu1 %v1841_v0 }
 0x152   :  { %496 = vmatpush1.bf16.msra.mxu0 %v1912_v10  ;;  %1488 = vmatpush3.bf16.msra.mxu1 %v1938_v19 }
 0x153   :  { %497 = vmatprep.subr.bf16.mxu0 %v1914_v11  ;;  %1489 = vmatprep.subr.bf16.mxu1 %v1841_v0 }
 0x156   :  { %498 = vmatpush1.bf16.msra.mxu0 %v1921_v14  ;;  %1490 = vmatpush3.bf16.msra.mxu1 %v1948_v22 }
 0x157   :  { %499 = vmatprep.subr.bf16.mxu0 %v1924_v15  ;;  %1491 = vmatprep.subr.bf16.mxu1 %v1841_v0 }
 0x15a   :  { %500 = vmatpush1.bf16.msra.mxu0 %v1932_v17  ;;  %1492 = vmatpush3.bf16.msra.mxu1 %v1958_v25 }
 0x15b   :  { %501 = vmatprep.subr.bf16.mxu0 %v1935_v18  ;;  %1493 = vmatprep.subr.bf16.mxu1 %v1841_v0 }
 0x15e   :  { %502 = vmatpush1.bf16.msra.mxu0 %v1942_v20  ;;  %1494 = vmatpush3.bf16.msra.mxu1 %v1965_v27 }
 0x15f   :  { %503 = vmatprep.subr.bf16.mxu0 %v1945_v21  ;;  %1495 = vmatprep.subr.bf16.mxu1 %v1841_v0 }
 0x162   :  { %504 = vmatpush1.bf16.msra.mxu0 %v1952_v23  ;;  %1496 = vmatpush3.bf16.msra.mxu1 %v1972_v28 }
 0x163   :  { %623 = vmatprep.subr.bf16.mxu0 %v1890_v2  ;;  %1501 = vmatprep.subr.bf16.mxu1 %v1841_v0 }
 0x205   :  { %v389_v29 = vpop.f32.mrf.mxu0  ;;  %v430_v30 = vpop.f32.mrf.mxu1 }
 0x206   :  { %v438_v31 = vrot.slane %v389_v29, 6  ;;  %v461_v48 = vadd.f32 %v2013_v47, %v430_v30 }
 0x207   :  { %v391_v32 = vpop.f32.mrf.mxu0  ;;  %v1479_v33 = vpop.f32.mrf.mxu1 }
 0x208   :  { %v440_v34 = vadd.f32 %v438_v31, %v436_v26  ;;  %v452_v42 = vrot.slane %v391_v32, 6  ;;  %v463_v50 = vrot.slane %v461_v48, 6 }
 0x209   :  { %v393_v35 = vpop.f32.mrf.mxu0  ;;  %v433_v36 = vpop.f32.mrf.mxu1 }
 0x20a   :  { %v1348_v37 = vmul.f32 -1.442695, %v440_v34  ;;  %v454_v43 = vadd.f32 %v452_v42, %v450_v41 }
 0x20b   :  { %v394_v38 = vpop.f32.mrf.mxu0  ;;  %v1480_v39 = vpop.f32.mrf.mxu1 }
 0x20c   :  { %1654 = vpow2.f32 %v1348_v37  ;;  %v1349_v46 = vmul.f32 -1.442695, %v454_v43 }
 0x219   :  { %v1655_v44 = vpop.eup %1654 }
 0x21a   :  { %v444_v45 = vadd.f32 1.0, %v1655_v44 }
 0x21c   :  { %1656 = vrcp.f32 %v444_v45 }
 0x21d   :  { %1658 = vpow2.f32 %v1349_v46 }
 0x229   :  { %v1657_v52 = vpop.eup %1656 }
 0x22a   :  { %v465_v53 = vmul.f32 %v1657_v52, %v463_v50  ;;  %v1659_v55 = vpop.eup %1658 }
 0x22b   :  { %v458_v56 = vadd.f32 1.0, %v1659_v55  ;;  %v487_v55 = vld [vmem:[#allocation3 + $0x8] sm:$0x4] }
 0x22c   :  { %v467_v54 = vadd.f32 %v466_v51, %v465_v53 }
 0x22e   :  { %1660 = vtanh.f32 %v467_v54 }
 0x22f   :  { %1662 = vrcp.f32 %v458_v56 }
 0x23b   :  { %v1661_v58 = vpop.eup %1660 }
 0x23c   :  { %v470_v59 = vrot.slane %v1661_v58, 2  ;;  %v1663_v13 = vpop.eup %1662 }
 0x23e   :  { %v472_v60 = vsub.f32 %v2026_v63, %v470_v59 }
 0x240   :  { %v474_v61 = vrot.slane %v472_v60, 6 }
 0x242   :  { %v476_v24 = vmul.f32 %v1663_v13, %v474_v61 }
 0x244   :  { %v477_v26 = vadd.f32 %v1661_v58, %v476_v24  ;;  %v600_v58 = vunpack.c.l.bf16 %v487_v55 }
 0x246   :  { %v482_v29 = vrot.slane %v477_v26, 2 }
 0x248   :  { %v484_v30 = vsel %vm1350_vm2, %v482_v29, 0.0  ;;  %v2069_v31 = vsel %vm1350_vm2, %v482_v29, %v2026_v63 }
 0x249   :  { %v488_v32 = vpack.c.bf16 %v2069_v31, %v2069_v31  ;;  %v755_v33 = vrot.slane %v484_v30, 6 }
 0x24b   :  { %522 = vmatmul.mubr.bf16.vlgmr.msra.gmra.mxu0 %v488_v32  ;;  %1498 = vmatmul.mubr.bf16.vlgmr.msra.gmra.mxu1 %v488_v32  ;;  %v2075_v34 = vsel %vm763_vm3, %v2023_v62, %v755_v33  ;;  %v486_v62 = vld [vmem:[#allocation3] sm:$0x44] }
 0x24c   :  { %624 = vmatpush1.bf16.msra.mxu0 %v1892_v3  ;;  %1502 = vmatpush3.bf16.msra.mxu1 %v1909_v9  ;;  %v570_v63 = vunpack.c.l.bf16 %v486_v62  ;;  %v582_v46 = vrot.slane %v486_v62, 4 }
 0x24d   :  { %625 = vmatprep.subr.bf16.mxu0 %v1895_v4  ;;  %1503 = vmatprep.subr.bf16.mxu1 %v1841_v0 }
 0x24e   :  { %655 = vmatprep.mubr.bf16.mxu0 %v1842_v1  ;;  %1517 = vmatprep.mubr.msk.bf16.mxu1 %vm1843_vm0, %v1841_v0  ;;  %v584_v48 = vunpack.c.l.bf16 %v582_v46 }
 0x250   :  { %626 = vmatpush1.bf16.msra.mxu0 %v1898_v5  ;;  %1504 = vmatpush3.bf16.msra.mxu1 %v1918_v12 }
 0x251   :  { %627 = vmatprep.subr.bf16.mxu0 %v1901_v6  ;;  %1505 = vmatprep.subr.bf16.mxu1 %v1841_v0 }
 0x254   :  { %628 = vmatpush1.bf16.msra.mxu0 %v1904_v7  ;;  %1506 = vmatpush3.bf16.msra.mxu1 %v1928_v16 }
 0x255   :  { %629 = vmatprep.subr.bf16.mxu0 %v1907_v8  ;;  %1507 = vmatprep.subr.bf16.mxu1 %v1841_v0 }
 0x258   :  { %630 = vmatpush1.bf16.msra.mxu0 %v1912_v10  ;;  %1508 = vmatpush3.bf16.msra.mxu1 %v1938_v19 }
 0x259   :  { %631 = vmatprep.subr.bf16.mxu0 %v1914_v11  ;;  %1509 = vmatprep.subr.bf16.mxu1 %v1841_v0 }
 0x25c   :  { %632 = vmatpush1.bf16.msra.mxu0 %v1921_v14  ;;  %1510 = vmatpush3.bf16.msra.mxu1 %v1948_v22 }
 0x25d   :  { %633 = vmatprep.subr.bf16.mxu0 %v1924_v15  ;;  %1511 = vmatprep.subr.bf16.mxu1 %v1841_v0 }
 0x260   :  { %634 = vmatpush1.bf16.msra.mxu0 %v1932_v17  ;;  %1512 = vmatpush3.bf16.msra.mxu1 %v1958_v25 }
 0x261   :  { %635 = vmatprep.subr.bf16.mxu0 %v1935_v18  ;;  %1513 = vmatprep.subr.bf16.mxu1 %v1841_v0 }
 0x264   :  { %636 = vmatpush1.bf16.msra.mxu0 %v1942_v20  ;;  %1514 = vmatpush3.bf16.msra.mxu1 %v1965_v27 }
 0x265   :  { %637 = vmatprep.subr.bf16.mxu0 %v1945_v21  ;;  %1515 = vmatprep.subr.bf16.mxu1 %v1841_v0 }
 0x268   :  { %638 = vmatpush1.bf16.msra.mxu0 %v1952_v23  ;;  %1516 = vmatpush3.bf16.msra.mxu1 %v1972_v28 }
 0x269   :  { %773 = vmatprep.subr.bf16.mxu0 %v1890_v2  ;;  %1521 = vmatprep.subr.bf16.mxu1 %v1841_v0 }
 0x30b   :  { %v523_v35 = vpop.f32.mrf.mxu0  ;;  %v564_v36 = vpop.f32.mrf.mxu1 }
 0x30c   :  { %v572_v37 = vrot.slane %v523_v35, 4  ;;  %v595_v54 = vadd.f32 %v2013_v47, %v564_v36 }
 0x30d   :  { %v525_v38 = vpop.f32.mrf.mxu0  ;;  %v1499_v39 = vpop.f32.mrf.mxu1 }
 0x30e   :  { %v574_v40 = vadd.f32 %v572_v37, %v570_v63  ;;  %v586_v49 = vrot.slane %v525_v38, 4  ;;  %v597_v56 = vrot.slane %v595_v54, 4 }
 0x30f   :  { %v527_v41 = vpop.f32.mrf.mxu0  ;;  %v567_v42 = vpop.f32.mrf.mxu1 }
 0x310   :  { %v1351_v43 = vmul.f32 -1.442695, %v574_v40  ;;  %v588_v50 = vadd.f32 %v586_v49, %v584_v48 }
 0x311   :  { %v528_v44 = vpop.f32.mrf.mxu0  ;;  %v1500_v45 = vpop.f32.mrf.mxu1 }
 0x312   :  { %1664 = vpow2.f32 %v1351_v43  ;;  %v1352_v53 = vmul.f32 -1.442695, %v588_v50 }
 0x31f   :  { %v1665_v51 = vpop.eup %1664 }
 0x320   :  { %v578_v52 = vadd.f32 1.0, %v1665_v51 }
 0x322   :  { %1666 = vrcp.f32 %v578_v52 }
 0x323   :  { %1668 = vpow2.f32 %v1352_v53 }
 0x32f   :  { %v1667_v59 = vpop.eup %1666 }
 0x330   :  { %v599_v60 = vmul.f32 %v1667_v59, %v597_v56  ;;  %v1669_v13 = vpop.eup %1668 }
 0x331   :  { %v592_v24 = vadd.f32 1.0, %v1669_v13  ;;  %v621_v13 = vld [vmem:[#allocation3 + $0x8] sm:$0x8] }
 0x332   :  { %v601_v61 = vadd.f32 %v600_v58, %v599_v60 }
 0x334   :  { %1670 = vtanh.f32 %v601_v61 }
 0x335   :  { %1672 = vrcp.f32 %v592_v24 }
 0x341   :  { %v1671_v26 = vpop.eup %1670 }
 0x342   :  { %v604_v29 = vrot.slane %v1671_v26, 4  ;;  %v1673_v33 = vpop.eup %1672 }
 0x344   :  { %v606_v30 = vsub.f32 %v2069_v31, %v604_v29 }
 0x346   :  { %v608_v32 = vrot.slane %v606_v30, 4 }
 0x348   :  { %v610_v62 = vmul.f32 %v1673_v33, %v608_v32 }
 0x34a   :  { %v611_v63 = vadd.f32 %v1671_v26, %v610_v62  ;;  %v734_v26 = vunpack.c.l.bf16 %v621_v13 }
 0x34c   :  { %v616_v35 = vrot.slane %v611_v63, 4 }
 0x34e   :  { %v618_v36 = vsel %vm1353_vm4, %v616_v35, 0.0  ;;  %v2116_v37 = vsel %vm1353_vm4, %v616_v35, %v2069_v31  ;;  %v620_v31 = vld [vmem:[#allocation3] sm:$0x88] }
 0x34f   :  { %v622_v38 = vpack.c.bf16 %v2116_v37, %v2116_v37  ;;  %v758_v39 = vrot.slane %v618_v36, 4  ;;  %v716_v53 = vrot.slane %v620_v31, 4 }
 0x351   :  { %656 = vmatmul.mubr.bf16.vlgmr.msra.gmra.mxu0 %v622_v38  ;;  %1518 = vmatmul.mubr.bf16.vlgmr.msra.gmra.mxu1 %v622_v38  ;;  %v2122_v40 = vsel %vm765_vm5, %v2075_v34, %v758_v39  ;;  %v704_v34 = vunpack.c.l.bf16 %v620_v31  ;;  %v718_v54 = vunpack.c.l.bf16 %v716_v53 }
 0x352   :  { %774 = vmatpush1.bf16.msra.mxu0 %v1892_v3  ;;  %1522 = vmatpush3.bf16.msra.mxu1 %v1909_v9 }
 0x353   :  { %775 = vmatprep.subr.bf16.mxu0 %v1895_v4  ;;  %1523 = vmatprep.subr.bf16.mxu1 %v1841_v0 }
 0x354   :  { %805 = vmatprep.mubr.bf16.mxu0 %v1842_v1  ;;  %1537 = vmatprep.mubr.msk.bf16.mxu1 %vm1843_vm0, %v1841_v0 }
 0x356   :  { %776 = vmatpush1.bf16.msra.mxu0 %v1898_v5  ;;  %1524 = vmatpush3.bf16.msra.mxu1 %v1918_v12 }
 0x357   :  { %777 = vmatprep.subr.bf16.mxu0 %v1901_v6  ;;  %1525 = vmatprep.subr.bf16.mxu1 %v1841_v0 }
 0x35a   :  { %778 = vmatpush1.bf16.msra.mxu0 %v1904_v7  ;;  %1526 = vmatpush3.bf16.msra.mxu1 %v1928_v16 }
 0x35b   :  { %779 = vmatprep.subr.bf16.mxu0 %v1907_v8  ;;  %1527 = vmatprep.subr.bf16.mxu1 %v1841_v0 }
 0x35e   :  { %780 = vmatpush1.bf16.msra.mxu0 %v1912_v10  ;;  %1528 = vmatpush3.bf16.msra.mxu1 %v1938_v19 }
 0x35f   :  { %781 = vmatprep.subr.bf16.mxu0 %v1914_v11  ;;  %1529 = vmatprep.subr.bf16.mxu1 %v1841_v0 }
 0x362   :  { %782 = vmatpush1.bf16.msra.mxu0 %v1921_v14  ;;  %1530 = vmatpush3.bf16.msra.mxu1 %v1948_v22 }
 0x363   :  { %783 = vmatprep.subr.bf16.mxu0 %v1924_v15  ;;  %1531 = vmatprep.subr.bf16.mxu1 %v1841_v0 }
 0x366   :  { %784 = vmatpush1.bf16.msra.mxu0 %v1932_v17  ;;  %1532 = vmatpush3.bf16.msra.mxu1 %v1958_v25 }
 0x367   :  { %785 = vmatprep.subr.bf16.mxu0 %v1935_v18  ;;  %1533 = vmatprep.subr.bf16.mxu1 %v1841_v0 }
 0x36a   :  { %786 = vmatpush1.bf16.msra.mxu0 %v1942_v20  ;;  %1534 = vmatpush3.bf16.msra.mxu1 %v1965_v27 }
 0x36b   :  { %787 = vmatprep.subr.bf16.mxu0 %v1945_v21  ;;  %1535 = vmatprep.subr.bf16.mxu1 %v1841_v0 }
 0x36e   :  { %788 = vmatpush1.bf16.msra.mxu0 %v1952_v23  ;;  %1536 = vmatpush3.bf16.msra.mxu1 %v1972_v28 }
 0x36f   :  { %889 = vmatprep.subr.bf16.mxu0 %v1890_v2  ;;  %1541 = vmatprep.subr.bf16.mxu1 %v1841_v0 }
 0x411   :  { %v657_v41 = vpop.f32.mrf.mxu0  ;;  %v698_v42 = vpop.f32.mrf.mxu1 }
 0x412   :  { %v706_v43 = vrot.slane %v657_v41, 2  ;;  %v729_v61 = vadd.f32 %v2013_v47, %v698_v42 }
 0x413   :  { %v659_v44 = vpop.f32.mrf.mxu0  ;;  %v1519_v45 = vpop.f32.mrf.mxu1 }
 0x414   :  { %v708_v46 = vadd.f32 %v706_v43, %v704_v34  ;;  %v720_v55 = vrot.slane %v659_v44, 2  ;;  %v731_v24 = vrot.slane %v729_v61, 2 }
 0x415   :  { %v661_v48 = vpop.f32.mrf.mxu0  ;;  %v701_v49 = vpop.f32.mrf.mxu1 }
 0x416   :  { %v1354_v50 = vmul.f32 -1.442695, %v708_v46  ;;  %v722_v56 = vadd.f32 %v720_v55, %v718_v54 }
 0x417   :  { %v662_v51 = vpop.f32.mrf.mxu0  ;;  %v1520_v52 = vpop.f32.mrf.mxu1 }
 0x418   :  { %1674 = vpow2.f32 %v1354_v50  ;;  %v1355_v60 = vmul.f32 -1.442695, %v722_v56 }
 0x425   :  { %v1675_v58 = vpop.eup %1674 }
 0x426   :  { %v712_v59 = vadd.f32 1.0, %v1675_v58 }
 0x428   :  { %1676 = vrcp.f32 %v712_v59 }
 0x429   :  { %1678 = vpow2.f32 %v1355_v60 }
 0x435   :  { %v1677_v29 = vpop.eup %1676 }
 0x436   :  { %v733_v30 = vmul.f32 %v1677_v29, %v731_v24  ;;  %v1679_v33 = vpop.eup %1678 }
 0x437   :  { %v726_v62 = vadd.f32 1.0, %v1679_v33 }
 0x438   :  { %v735_v32 = vadd.f32 %v734_v26, %v733_v30  ;;  %v771_v26 = vld [vmem:[#allocation3 + $0x14] sm:$0x1] }
 0x43a   :  { %1680 = vtanh.f32 %v735_v32  ;;  %v875_v32 = vunpack.c.l.bf16 %v771_v26  ;;  %v1726_v26 = vld [vmem:[#allocation8 + $0xb0] ss:$12 sps:$4 sm:$0xff]  }
 0x43b   :  { %1682 = vrcp.f32 %v726_v62 }
 0x447   :  { %v1681_v63 = vpop.eup %1680 }
 0x448   :  { %v738_v35 = vrot.slane %v1681_v63, 6  ;;  %v1683_v39 = vpop.eup %1682 }
 0x44a   :  { %v740_v36 = vsub.f32 %v2116_v37, %v738_v35 }
 0x44c   :  { %v742_v38 = vrot.slane %v740_v36, 2 }
 0x44e   :  { %v744_v31 = vmul.f32 %v1683_v39, %v742_v38 }
 0x450   :  { %v745_v34 = vadd.f32 %v1681_v63, %v744_v31 }
 0x452   :  { %v750_v41 = vrot.slane %v745_v34, 6 }
 0x454   :  { %v752_v42 = vsel %vm1356_vm6, %v750_v41, 0.0  ;;  %v2163_v43 = vsel %vm1356_vm6, %v750_v41, %v2116_v37  ;;  %v770_v37 = vld [vmem:[#allocation3 + $0xc] sm:$0x11] }
 0x455   :  { %v761_v44 = vrot.slane %v752_v42, 2  ;;  %v772_v45 = vpack.c.bf16 %v2163_v43, %v2163_v43  ;;  %v863_v54 = vrot.slane %v770_v37, 4 }
 0x457   :  { %806 = vmatmul.mubr.bf16.vlgmr.msra.gmra.mxu0 %v772_v45  ;;  %1538 = vmatmul.mubr.bf16.vlgmr.msra.gmra.mxu1 %v772_v45  ;;  %v768_v46 = vsel %vm767_vm7, %v2122_v40, %v761_v44  ;;  %v854_v40 = vunpack.c.l.bf16 %v770_v37  ;;  %v865_v60 = vunpack.c.l.bf16 %v863_v54 }
 0x458   :  { %890 = vmatpush1.bf16.msra.mxu0 %v1892_v3  ;;  %1542 = vmatpush3.bf16.msra.mxu1 %v1909_v9  ;;  %769 = vst [vmem:[#allocation9] sm:$0xff] %v768_v46 }
 0x459   :  { %891 = vmatprep.subr.bf16.mxu0 %v1895_v4  ;;  %1543 = vmatprep.subr.bf16.mxu1 %v1841_v0 }
 0x45a   :  { %921 = vmatprep.mubr.bf16.mxu0 %v1842_v1  ;;  %1557 = vmatprep.mubr.msk.bf16.mxu1 %vm1843_vm0, %v1841_v0 }
 0x45c   :  { %892 = vmatpush1.bf16.msra.mxu0 %v1898_v5  ;;  %1544 = vmatpush3.bf16.msra.mxu1 %v1918_v12 }
 0x45d   :  { %893 = vmatprep.subr.bf16.mxu0 %v1901_v6  ;;  %1545 = vmatprep.subr.bf16.mxu1 %v1841_v0 }
 0x460   :  { %894 = vmatpush1.bf16.msra.mxu0 %v1904_v7  ;;  %1546 = vmatpush3.bf16.msra.mxu1 %v1928_v16 }
 0x461   :  { %895 = vmatprep.subr.bf16.mxu0 %v1907_v8  ;;  %1547 = vmatprep.subr.bf16.mxu1 %v1841_v0 }
 0x464   :  { %896 = vmatpush1.bf16.msra.mxu0 %v1912_v10  ;;  %1548 = vmatpush3.bf16.msra.mxu1 %v1938_v19 }
 0x465   :  { %897 = vmatprep.subr.bf16.mxu0 %v1914_v11  ;;  %1549 = vmatprep.subr.bf16.mxu1 %v1841_v0 }
 0x468   :  { %898 = vmatpush1.bf16.msra.mxu0 %v1921_v14  ;;  %1550 = vmatpush3.bf16.msra.mxu1 %v1948_v22 }
 0x469   :  { %899 = vmatprep.subr.bf16.mxu0 %v1924_v15  ;;  %1551 = vmatprep.subr.bf16.mxu1 %v1841_v0 }
 0x46c   :  { %900 = vmatpush1.bf16.msra.mxu0 %v1932_v17  ;;  %1552 = vmatpush3.bf16.msra.mxu1 %v1958_v25 }
 0x46d   :  { %901 = vmatprep.subr.bf16.mxu0 %v1935_v18  ;;  %1553 = vmatprep.subr.bf16.mxu1 %v1841_v0 }
 0x470   :  { %902 = vmatpush1.bf16.msra.mxu0 %v1942_v20  ;;  %1554 = vmatpush3.bf16.msra.mxu1 %v1965_v27 }
 0x471   :  { %903 = vmatprep.subr.bf16.mxu0 %v1945_v21  ;;  %1555 = vmatprep.subr.bf16.mxu1 %v1841_v0 }
 0x474   :  { %904 = vmatpush1.bf16.msra.mxu0 %v1952_v23  ;;  %1556 = vmatpush3.bf16.msra.mxu1 %v1972_v28 }
 0x475   :  { %1023 = vmatprep.subr.bf16.mxu0 %v1890_v2  ;;  %1561 = vmatprep.subr.bf16.mxu1 %v1841_v0 }
 0x517   :  { %v807_v48 = vpop.f32.mrf.mxu0  ;;  %v848_v49 = vpop.f32.mrf.mxu1 }
 0x518   :  { %v855_v50 = vadd.f32 %v854_v40, %v807_v48  ;;  %v873_v30 = vadd.f32 %v2013_v47, %v848_v49 }
 0x519   :  { %v809_v51 = vpop.f32.mrf.mxu0  ;;  %v1539_v52 = vpop.f32.mrf.mxu1 }
 0x51a   :  { %v1357_v53 = vmul.f32 -1.442695, %v855_v50  ;;  %v866_v61 = vadd.f32 %v865_v60, %v809_v51 }
 0x51b   :  { %v811_v55 = vpop.f32.mrf.mxu0  ;;  %v851_v56 = vpop.f32.mrf.mxu1 }
 0x51c   :  { %1684 = vpow2.f32 %v1357_v53  ;;  %v1358_v13 = vmul.f32 -1.442695, %v866_v61 }
 0x51d   :  { %v812_v58 = vpop.f32.mrf.mxu0  ;;  %v1540_v59 = vpop.f32.mrf.mxu1 }
 0x51e   :  { %1686 = vpow2.f32 %v1358_v13 }
 0x529   :  { %v1685_v2 = vpop.eup %1684 }
 0x52a   :  { %v859_v24 = vadd.f32 1.0, %v1685_v2 }
 0x52b   :  { %v1687_v29 = vpop.eup %1686 }
 0x52c   :  { %1688 = vrcp.f32 %v859_v24  ;;  %v870_v35 = vadd.f32 1.0, %v1687_v29  ;;  %v1725_v24 = vld [vmem:[#allocation8 + $0xa8] ss:$12 sps:$4 sm:$0xff]  }
 0x52d   :  { %v1727_v29 = vld [vmem:[#allocation8 + $0x94] ss:$12 sps:$4 sm:$0xff]  }
 0x539   :  { %v1689_v33 = vpop.eup %1688 }
 0x53a   :  { %v874_v62 = vmul.f32 %v1689_v33, %v873_v30  ;;  %v1728_v30 = vld [vmem:[#allocation8 + $0x90] ss:$12 sps:$4 sm:$0xff]  }
 0x53b   :  { %v1730_v33 = vld [vmem:[#allocation8 + $0x7c] ss:$12 sps:$4 sm:$0xff]  }
 0x53c   :  { %v876_v63 = vadd.f32 %v875_v32, %v874_v62  ;;  %v1729_v32 = vld [vmem:[#allocation8 + $0x98] ss:$12 sps:$4 sm:$0xff]  }
 0x53d   :  { %v1731_v62 = vld [vmem:[#allocation8 + $0x78] ss:$12 sps:$4 sm:$0xff]  }
 0x53e   :  { %1690 = vtanh.f32 %v876_v63  ;;  %v1732_v63 = vld [vmem:[#allocation8 + $0x80] ss:$12 sps:$4 sm:$0xff]  }
 0x53f   :  { %1692 = vrcp.f32 %v870_v35  ;;  %v1733_v35 = vld [vmem:[#allocation8 + $0x64] ss:$12 sps:$4 sm:$0xff]  }
 0x54b   :  { %v1691_v36 = vpop.eup %1690 }
 0x54c   :  { %v878_v38 = vsub.f32 %v2163_v43, %v1691_v36  ;;  %v1693_v39 = vpop.eup %1692 }
 0x54e   :  { %v879_v31 = vmul.f32 %v1693_v39, %v878_v38  ;;  %v1736_v38 = vld [vmem:[#allocation8 + $0x4c] ss:$12 sps:$4 sm:$0xff]   ;;  %v1737_v39 = vld [vmem:[#allocation8 + $0x48] ss:$12 sps:$4 sm:$0xff]  }
 0x550   :  { %v880_v34 = vadd.f32 %v1691_v36, %v879_v31  ;;  %v1735_v36 = vld [vmem:[#allocation8 + $0x68] ss:$12 sps:$4 sm:$0xff]   ;;  %v1738_v31 = vld [vmem:[#allocation8 + $0x50] ss:$12 sps:$4 sm:$0xff]  }
 0x552   :  { %v2207_v41 = vsel %vm1359_vm8, %v880_v34, 0.0  ;;  %v2210_v42 = vsel %vm1359_vm8, %v880_v34, %v2163_v43  ;;  %v1739_v34 = vld [vmem:[#allocation8 + $0x34] ss:$12 sps:$4 sm:$0xff]  }
 0x553   :  { %v888_v44 = vpack.c.bf16 %v2210_v42, %v2210_v42 }
 0x555   :  { %922 = vmatmul.mubr.bf16.vlgmr.msra.gmra.mxu0 %v888_v44  ;;  %1558 = vmatmul.mubr.bf16.vlgmr.msra.gmra.mxu1 %v888_v44  ;;  %v1742_v44 = vld [vmem:[#allocation8 + $0x1c] ss:$12 sps:$4 sm:$0xff]  }
 0x556   :  { %1024 = vmatpush1.bf16.msra.mxu0 %v1892_v3  ;;  %1562 = vmatpush3.bf16.msra.mxu1 %v1909_v9  ;;  %v1724_v3 = vld [vmem:[#allocation8 + $0xac] ss:$12 sps:$4 sm:$0xff]  }
 0x557   :  { %1025 = vmatprep.subr.bf16.mxu0 %v1895_v4  ;;  %1563 = vmatprep.subr.bf16.mxu1 %v1841_v0  ;;  %v886_v4 = vld [vmem:[#allocation3 + $0xc] sm:$0x22] }
 0x558   :  { %1055 = vmatprep.mubr.bf16.mxu0 %v1842_v1  ;;  %1577 = vmatprep.mubr.msk.bf16.mxu1 %vm1843_vm0, %v1841_v0 }
 0x55a   :  { %1026 = vmatpush1.bf16.msra.mxu0 %v1898_v5  ;;  %1564 = vmatpush3.bf16.msra.mxu1 %v1918_v12  ;;  %v970_v5 = vunpack.c.l.bf16 %v886_v4 }
 0x55b   :  { %1027 = vmatprep.subr.bf16.mxu0 %v1901_v6  ;;  %1565 = vmatprep.subr.bf16.mxu1 %v1841_v0 }
 0x55e   :  { %1028 = vmatpush1.bf16.msra.mxu0 %v1904_v7  ;;  %1566 = vmatpush3.bf16.msra.mxu1 %v1928_v16 }
 0x55f   :  { %1029 = vmatprep.subr.bf16.mxu0 %v1907_v8  ;;  %1567 = vmatprep.subr.bf16.mxu1 %v1841_v0 }
 0x562   :  { %1030 = vmatpush1.bf16.msra.mxu0 %v1912_v10  ;;  %1568 = vmatpush3.bf16.msra.mxu1 %v1938_v19 }
 0x563   :  { %1031 = vmatprep.subr.bf16.mxu0 %v1914_v11  ;;  %1569 = vmatprep.subr.bf16.mxu1 %v1841_v0 }
 0x566   :  { %1032 = vmatpush1.bf16.msra.mxu0 %v1921_v14  ;;  %1570 = vmatpush3.bf16.msra.mxu1 %v1948_v22 }
 0x567   :  { %1033 = vmatprep.subr.bf16.mxu0 %v1924_v15  ;;  %1571 = vmatprep.subr.bf16.mxu1 %v1841_v0 }
 0x56a   :  { %1034 = vmatpush1.bf16.msra.mxu0 %v1932_v17  ;;  %1572 = vmatpush3.bf16.msra.mxu1 %v1958_v25 }
 0x56b   :  { %1035 = vmatprep.subr.bf16.mxu0 %v1935_v18  ;;  %1573 = vmatprep.subr.bf16.mxu1 %v1841_v0  ;;  %v982_v18 = vrot.slane %v886_v4, 4  ;;  %v1744_v4 = vld [vmem:[#allocation8 + $0x20] ss:$12 sps:$4 sm:$0xff]  }
 0x56d   :  { %v984_v19 = vunpack.c.l.bf16 %v982_v18 }
 0x56e   :  { %1036 = vmatpush1.bf16.msra.mxu0 %v1942_v20  ;;  %1574 = vmatpush3.bf16.msra.mxu1 %v1965_v27 }
 0x56f   :  { %1037 = vmatprep.subr.bf16.mxu0 %v1945_v21  ;;  %1575 = vmatprep.subr.bf16.mxu1 %v1841_v0 }
 0x572   :  { %1038 = vmatpush1.bf16.msra.mxu0 %v1952_v23  ;;  %1576 = vmatpush3.bf16.msra.mxu1 %v1972_v28  ;;  %v887_v28 = vld [vmem:[#allocation3 + $0x14] sm:$0x2] }
 0x573   :  { %1157 = vmatprep.subr.bf16.mxu0 %v1724_v3  ;;  %1581 = vmatprep.subr.bf16.mxu1 %v1841_v0  ;;  %v1000_v45 = vunpack.c.l.bf16 %v887_v28  ;;  %v1743_v3 = vld [vmem:[#allocation8 + $0x18] ss:$12 sps:$4 sm:$0xff]  }
 0x615   :  { %v923_v6 = vpop.f32.mrf.mxu0  ;;  %v964_v7 = vpop.f32.mrf.mxu1 }
 0x616   :  { %v972_v8 = vrot.slane %v923_v6, 6  ;;  %v995_v27 = vadd.f32 %v2013_v47, %v964_v7  ;;  %v1746_v6 = vld [vmem:[#allocation8] ss:$12 sps:$4 sm:$0xff]   ;;  %v1747_v7 = vld [vmem:[#allocation8 + $0x8] ss:$12 sps:$4 sm:$0xff]  }
 0x617   :  { %v925_v9 = vpop.f32.mrf.mxu0  ;;  %v1559_v10 = vpop.f32.mrf.mxu1 }
 0x618   :  { %v974_v11 = vadd.f32 %v972_v8, %v970_v5  ;;  %v986_v20 = vrot.slane %v925_v9, 6  ;;  %v997_v43 = vrot.slane %v995_v27, 6  ;;  %v1745_v5 = vld [vmem:[#allocation8 + $0x4] ss:$12 sps:$4 sm:$0xff]   ;;  %v1020_v8 = vld [vmem:[#allocation3 + $0xc] sm:$0x44] }
 0x619   :  { %v927_v12 = vpop.f32.mrf.mxu0  ;;  %v967_v14 = vpop.f32.mrf.mxu1  ;;  %v1104_v9 = vunpack.c.l.bf16 %v1020_v8 }
 0x61a   :  { %v1360_v15 = vmul.f32 -1.442695, %v974_v11  ;;  %v988_v21 = vadd.f32 %v986_v20, %v984_v19 }
 0x61b   :  { %v928_v16 = vpop.f32.mrf.mxu0  ;;  %v1560_v17 = vpop.f32.mrf.mxu1 }
 0x61c   :  { %1694 = vpow2.f32 %v1360_v15  ;;  %v1361_v25 = vmul.f32 -1.442695, %v988_v21 }
 0x629   :  { %v1695_v22 = vpop.eup %1694 }
 0x62a   :  { %v978_v23 = vadd.f32 1.0, %v1695_v22  ;;  %v1116_v22 = vrot.slane %v1020_v8, 4  ;;  %v1155_v8 = vld [vmem:[#allocation3 + $0x14] sm:$0x8] }
 0x62c   :  { %1696 = vrcp.f32 %v978_v23 }
 0x62d   :  { %1698 = vpow2.f32 %v1361_v25 }
 0x639   :  { %v1697_v46 = vpop.eup %1696 }
 0x63a   :  { %v999_v37 = vmul.f32 %v1697_v46, %v997_v43  ;;  %v1699_v48 = vpop.eup %1698  ;;  %v1021_v46 = vld [vmem:[#allocation3 + $0x14] sm:$0x4] }
 0x63b   :  { %v992_v49 = vadd.f32 1.0, %v1699_v48 }
 0x63c   :  { %v1001_v40 = vadd.f32 %v1000_v45, %v999_v37 }
 0x63e   :  { %1700 = vtanh.f32 %v1001_v40  ;;  %v1134_v40 = vunpack.c.l.bf16 %v1021_v46 }
 0x63f   :  { %1702 = vrcp.f32 %v992_v49 }
 0x64b   :  { %v1701_v50 = vpop.eup %1700 }
 0x64c   :  { %v1004_v51 = vrot.slane %v1701_v50, 2  ;;  %v1703_v54 = vpop.eup %1702 }
 0x64e   :  { %v1006_v52 = vsub.f32 %v2210_v42, %v1004_v51 }
 0x650   :  { %v1008_v53 = vrot.slane %v1006_v52, 6 }
 0x652   :  { %v1010_v55 = vmul.f32 %v1703_v54, %v1008_v53 }
 0x654   :  { %v1011_v56 = vadd.f32 %v1701_v50, %v1010_v55 }
 0x656   :  { %v1016_v58 = vrot.slane %v1011_v56, 2 }
 0x658   :  { %v1018_v59 = vsel %vm1362_vm9, %v1016_v58, 0.0  ;;  %v2252_v60 = vsel %vm1362_vm9, %v1016_v58, %v2210_v42  ;;  %v1741_v42 = vld [vmem:[#allocation8 + $0x38] ss:$12 sps:$4 sm:$0xff]  }
 0x659   :  { %v1022_v61 = vpack.c.bf16 %v2252_v60, %v2252_v60  ;;  %v1289_v13 = vrot.slane %v1018_v59, 6 }
 0x65b   :  { %1056 = vmatmul.mubr.bf16.vlgmr.msra.gmra.mxu0 %v1022_v61  ;;  %1578 = vmatmul.mubr.bf16.vlgmr.msra.gmra.mxu1 %v1022_v61  ;;  %v2258_v2 = vsel %vm763_vm3, %v2207_v41, %v1289_v13  ;;  %v1740_v41 = vld [vmem:[#allocation8 + $0x30] ss:$12 sps:$4 sm:$0xff]  }
 0x65c   :  { %1158 = vmatpush1.bf16.msra.mxu0 %v1725_v24  ;;  %1582 = vmatpush3.bf16.msra.mxu1 %v1726_v26 }
 0x65d   :  { %1159 = vmatprep.subr.bf16.mxu0 %v1727_v29  ;;  %1583 = vmatprep.subr.bf16.mxu1 %v1841_v0 }
 0x65e   :  { %1189 = vmatprep.mubr.bf16.mxu0 %v1842_v1  ;;  %1597 = vmatprep.mubr.msk.bf16.mxu1 %vm1843_vm0, %v1841_v0  ;;  %v1734_v1 = vld [vmem:[#allocation8 + $0x60] ss:$12 sps:$4 sm:$0xff]  }
 0x660   :  { %1160 = vmatpush1.bf16.msra.mxu0 %v1728_v30  ;;  %1584 = vmatpush3.bf16.msra.mxu1 %v1729_v32  ;;  %v1154_v32 = vld [vmem:[#allocation3 + $0xc] sm:$0x88] }
 0x661   :  { %1161 = vmatprep.subr.bf16.mxu0 %v1730_v33  ;;  %1585 = vmatprep.subr.bf16.mxu1 %v1841_v0  ;;  %v1238_v33 = vunpack.c.l.bf16 %v1154_v32 }
 0x664   :  { %1162 = vmatpush1.bf16.msra.mxu0 %v1731_v62  ;;  %1586 = vmatpush3.bf16.msra.mxu1 %v1732_v63 }
 0x665   :  { %1163 = vmatprep.subr.bf16.mxu0 %v1733_v35  ;;  %1587 = vmatprep.subr.bf16.mxu1 %v1841_v0 }
 0x668   :  { %1164 = vmatpush1.bf16.msra.mxu0 %v1734_v1  ;;  %1588 = vmatpush3.bf16.msra.mxu1 %v1735_v36 }
 0x669   :  { %1165 = vmatprep.subr.bf16.mxu0 %v1736_v38  ;;  %1589 = vmatprep.subr.bf16.mxu1 %v1841_v0 }
 0x66c   :  { %1166 = vmatpush1.bf16.msra.mxu0 %v1737_v39  ;;  %1590 = vmatpush3.bf16.msra.mxu1 %v1738_v31 }
 0x66d   :  { %1167 = vmatprep.subr.bf16.mxu0 %v1739_v34  ;;  %1591 = vmatprep.subr.bf16.mxu1 %v1841_v0 }
 0x670   :  { %1168 = vmatpush1.bf16.msra.mxu0 %v1740_v41  ;;  %1592 = vmatpush3.bf16.msra.mxu1 %v1741_v42  ;;  %v1250_v41 = vrot.slane %v1154_v32, 4 }
 0x671   :  { %1169 = vmatprep.subr.bf16.mxu0 %v1742_v44  ;;  %1593 = vmatprep.subr.bf16.mxu1 %v1841_v0 }
 0x672   :  { %v1252_v42 = vunpack.c.l.bf16 %v1250_v41 }
 0x674   :  { %1170 = vmatpush1.bf16.msra.mxu0 %v1743_v3  ;;  %1594 = vmatpush3.bf16.msra.mxu1 %v1744_v4 }
 0x675   :  { %1171 = vmatprep.subr.bf16.mxu0 %v1745_v5  ;;  %1595 = vmatprep.subr.bf16.mxu1 %v1841_v0  ;;  %v1118_v0 = vunpack.c.l.bf16 %v1116_v22 }
 0x678   :  { %1172 = vmatpush1.bf16.msra.mxu0 %v1746_v6  ;;  %1596 = vmatpush3.bf16.msra.mxu1 %v1747_v7  ;;  %v1748_v6 = vld [vmem:[%s2289_s3] ss:$0 sm:$0xff] }
 0x71b   :  { %v1057_v10 = vpop.f32.mrf.mxu0  ;;  %v1098_v11 = vpop.f32.mrf.mxu1 }
 0x71c   :  { %v1106_v12 = vrot.slane %v1057_v10, 4  ;;  %v1129_v45 = vadd.f32 %v2013_v47, %v1098_v11  ;;  %v1268_v10 = vunpack.c.l.bf16 %v1155_v8 }
 0x71d   :  { %v1059_v14 = vpop.f32.mrf.mxu0  ;;  %v1579_v15 = vpop.f32.mrf.mxu1 }
 0x71e   :  { %v1108_v16 = vadd.f32 %v1106_v12, %v1104_v9  ;;  %v1120_v23 = vrot.slane %v1059_v14, 4  ;;  %v1131_v37 = vrot.slane %v1129_v45, 4 }
 0x71f   :  { %v1061_v17 = vpop.f32.mrf.mxu0  ;;  %v1101_v18 = vpop.f32.mrf.mxu1 }
 0x720   :  { %v1363_v19 = vmul.f32 -1.442695, %v1108_v16  ;;  %v1122_v25 = vadd.f32 %v1120_v23, %v1118_v0  ;;  %v1749_v23 = vld [vmem:[%s2290_s4] sm:$0x3] }
 0x721   :  { %v1062_v20 = vpop.f32.mrf.mxu0  ;;  %v1580_v21 = vpop.f32.mrf.mxu1  ;;  %vm1368_vm11 = vcmp.gt.s32.totalorder %v1749_v23, 7 }
 0x722   :  { %1704 = vpow2.f32 %v1363_v19  ;;  %v1364_v43 = vmul.f32 -1.442695, %v1122_v25 }
 0x72f   :  { %v1705_v27 = vpop.eup %1704 }
 0x730   :  { %v1112_v28 = vadd.f32 1.0, %v1705_v27 }
 0x732   :  { %1706 = vrcp.f32 %v1112_v28 }
 0x733   :  { %1708 = vpow2.f32 %v1364_v43 }
 0x73f   :  { %v1707_v48 = vpop.eup %1706 }
 0x740   :  { %v1133_v49 = vmul.f32 %v1707_v48, %v1131_v37  ;;  %v1709_v51 = vpop.eup %1708 }
 0x741   :  { %v1126_v52 = vadd.f32 1.0, %v1709_v51 }
 0x742   :  { %v1135_v50 = vadd.f32 %v1134_v40, %v1133_v49 }
 0x744   :  { %1710 = vtanh.f32 %v1135_v50 }
 0x745   :  { %1712 = vrcp.f32 %v1126_v52 }
 0x751   :  { %v1711_v53 = vpop.eup %1710 }
 0x752   :  { %v1138_v54 = vrot.slane %v1711_v53, 4  ;;  %v1713_v58 = vpop.eup %1712 }
 0x754   :  { %v1140_v55 = vsub.f32 %v2252_v60, %v1138_v54 }
 0x756   :  { %v1142_v56 = vrot.slane %v1140_v55, 4 }
 0x758   :  { %v1144_v59 = vmul.f32 %v1713_v58, %v1142_v56 }
 0x75a   :  { %v1145_v61 = vadd.f32 %v1711_v53, %v1144_v59 }
 0x75c   :  { %v1150_v47 = vrot.slane %v1145_v61, 4 }
 0x75e   :  { %v1152_v13 = vsel %vm1365_vm10, %v1150_v47, 0.0  ;;  %v1153_v24 = vsel %vm1365_vm10, %v1150_v47, %v2252_v60 }
 0x75f   :  { %v1156_v26 = vpack.c.bf16 %v1153_v24, %v1153_v24  ;;  %v1292_v29 = vrot.slane %v1152_v13, 4 }
 0x761   :  { %1190 = vmatmul.mubr.bf16.vlgmr.msra.gmra.mxu0 %v1156_v26  ;;  %1598 = vmatmul.mubr.bf16.vlgmr.msra.gmra.mxu1 %v1156_v26  ;;  %v1298_v30 = vsel %vm765_vm5, %v2258_v2, %v1292_v29 }
 0x821   :  { %v1191_v62 = vpop.f32.mrf.mxu0  ;;  %v1232_v63 = vpop.f32.mrf.mxu1 }
 0x822   :  { %v1240_v35 = vrot.slane %v1191_v62, 2  ;;  %v1263_v7 = vadd.f32 %v1748_v6, %v1232_v63 }
 0x823   :  { %v1193_v1 = vpop.f32.mrf.mxu0  ;;  %v1599_v36 = vpop.f32.mrf.mxu1 }
 0x824   :  { %v1242_v38 = vadd.f32 %v1240_v35, %v1238_v33  ;;  %v1254_v44 = vrot.slane %v1193_v1, 2  ;;  %v1265_v9 = vrot.slane %v1263_v7, 2 }
 0x825   :  { %v1195_v57 = vpop.f32.mrf.mxu0  ;;  %v1235_v39 = vpop.f32.mrf.mxu1 }
 0x826   :  { %v1366_v31 = vmul.f32 -1.442695, %v1242_v38  ;;  %v1256_v3 = vadd.f32 %v1254_v44, %v1252_v42 }
 0x827   :  { %v1196_v34 = vpop.f32.mrf.mxu0  ;;  %v1600_v60 = vpop.f32.mrf.mxu1 }
 0x828   :  { %1714 = vpow2.f32 %v1366_v31  ;;  %v1367_v5 = vmul.f32 -1.442695, %v1256_v3 }
 0x835   :  { %v1715_v4 = vpop.eup %1714 }
 0x836   :  { %v1246_v2 = vadd.f32 1.0, %v1715_v4 }
 0x838   :  { %1716 = vrcp.f32 %v1246_v2 }
 0x839   :  { %1718 = vpow2.f32 %v1367_v5 }
 0x845   :  { %v1717_v11 = vpop.eup %1716 }
 0x846   :  { %v1267_v12 = vmul.f32 %v1717_v11, %v1265_v9  ;;  %v1719_v15 = vpop.eup %1718 }
 0x847   :  { %v1260_v16 = vadd.f32 1.0, %v1719_v15 }
 0x848   :  { %v1269_v14 = vadd.f32 %v1268_v10, %v1267_v12 }
 0x84a   :  { %1720 = vtanh.f32 %v1269_v14 }
 0x84b   :  { %1722 = vrcp.f32 %v1260_v16 }
 0x857   :  { %v1721_v17 = vpop.eup %1720 }
 0x858   :  { %v1272_v18 = vrot.slane %v1721_v17, 6  ;;  %v1723_v21 = vpop.eup %1722 }
 0x85a   :  { %v1274_v19 = vsub.f32 %v1153_v24, %v1272_v18 }
 0x85c   :  { %v1276_v20 = vrot.slane %v1274_v19, 2 }
 0x85e   :  { %v1278_v22 = vmul.f32 %v1723_v21, %v1276_v20 }
 0x860   :  { %v1279_v0 = vadd.f32 %v1721_v17, %v1278_v22 }
 0x862   :  { %v1284_v25 = vrot.slane %v1279_v0, 6 }
 0x864   :  { %v1286_v27 = vsel %vm1368_vm11, %v1284_v25, 0.0  ;;  %v1287_v28 = vsel %vm1368_vm11, %v1284_v25, %v1153_v24 }
 0x865   :  { %v1295_v43 = vrot.slane %v1286_v27, 2  ;;  %1301 = vst [vmem:[#allocation2] sm:$0x3] %v1287_v28 }
 0x867   :  { %v1299_v45 = vsel %vm767_vm7, %v1298_v30, %v1295_v43 }
 0x868   :  { %1300 = vst [vmem:[#allocation9 + $0x8] sm:$0xff] %v1299_v45 }
 0x869   :  { %1821 = shalt.err (!%p1818_p5)
}
 0x86a   :  { %s1845_s4 = smov 128   ;;  %s1846_s17 = smov 8  }
 0x86b   :  { %1313 = dma.vmem_to_hbm [thread:$0]  %s1308_s15, 256, %s2291_s5, [#allocation5], %s1845_s4, %s1845_s4, %s1846_s17  }
 0x86c   :  { %1834 = dma.done.wait [#allocation5], 256  }
 0x86d   :  { %1835 = vsyncadd [#allocation5], 4294967040 }
 0x86e   :  { %1317 = vsyncpa [#allocation4], 1 }
 0x86f   :  { %1318 = vsyncpa [#allocation7], 1 }
 0x870   :  { %1319 = vsyncpa [#allocation5], 1 }

</bundles_post_ra>
